<compile_context>
chip_gen: v5e
topology: v5e:2x2
jax: 0.10.0
libtpu: 0.0.40
codegen_flags: <defaults>
</compile_context>

<pallas_src>
import jax
import jax.numpy as jnp
from jax.experimental import pallas as pl
from jax.experimental.pallas import tpu as pltpu


_SMEM_SPEC = pl.BlockSpec(memory_space=pltpu.MemorySpace.SMEM)
_VMEM_LIMIT_BYTES = 32 * 1024 * 1024   # well under v7x's 64 MiB physical VMEM
_BN_EPS = 1e-5                         # nn.BatchNorm2d default
_LANE = 128


def _round_up(x, m):
    return (x + m - 1) // m * m


def _full(shape):
    """Full-array VMEM block for a grid=(1,) kernel."""
    return pl.BlockSpec(shape, lambda i, n=len(shape): (0,) * n)


# ------------------------------ fused kernel --------------------------------

def _build_fused_decoder_kernel(nblocks, louts, inv_ns, pack_widths, bn_eps):
    """Whole-chain fused kernel: all DecoderBlocks + final tanh block."""
    n_in = 11 * nblocks + 4

    def kernel(slopes_ref, z0_ref, *refs):
        in_refs = refs[:n_in]
        out_refs = refs[n_in:]

        z = z0_ref[...]                                  # f32, stays resident
        for i in range(nblocks):
            (emu_ref, evar_ref, eps_ref, fcw_ref, fcb_ref, ctk_ref, ctb_ref,
             g_ref, gt_ref, wh_ref, bh_ref) = in_refs[11 * i:11 * (i + 1)]
            a_fc = slopes_ref[2 * i]                     # PReLU slope after fc
            a_cv = slopes_ref[2 * i + 1]                 # PReLU slope after BN
            L = louts[i]
            inv_n = inv_ns[i]

            # x = PReLU(fc(z)) -- bf16 operands, f32 accumulate.
            x = jnp.dot(z.astype(jnp.bfloat16), fcw_ref[...],
                        preferred_element_type=jnp.float32) + fcb_ref[...]
            x = jnp.where(x >= 0.0, x, a_fc * x)

            # ConvTranspose2d(ks=2, stride=2, pad=0) as one matmul; ctK
            # columns are in NCHW flatten order (co, 2i+di, 2j+dj).
            y = jnp.dot(x.astype(jnp.bfloat16), ctk_ref[...],
                        preferred_element_type=jnp.float32) + ctb_ref[...]

            # BatchNorm2d(affine=False), batch stats, single pass:
            # stack (colsum, colsq) -> one matmul with G (N,C), broadcast back
            # with G^T (C,N).  All in f32 (tiny) to avoid cancellation issues.
            colsum = jnp.sum(y, axis=0, keepdims=True)
            colsq = jnp.sum(y * y, axis=0, keepdims=True)
            stacked = jnp.concatenate([colsum, colsq], axis=0)        # (2, N)
            stats_c = jnp.dot(stacked, g_ref[...],
                              preferred_element_type=jnp.float32) * inv_n
            bcast = jnp.dot(stats_c, gt_ref[...],
                            preferred_element_type=jnp.float32)       # (2, N)
            mean_b = bcast[0:1, :]
            var_b = jnp.maximum(bcast[1:2, :] - mean_b * mean_b, 0.0)
            h = (y - mean_b) * jax.lax.rsqrt(var_b + bn_eps)
            h = jnp.where(h >= 0.0, h, a_cv * h)

            # Fused mean|var head: one matmul, split columns.
            head = jnp.dot(h.astype(jnp.bfloat16), wh_ref[...],
                           preferred_element_type=jnp.float32) + bh_ref[...]
            dec_mu = head[:, :L]
            v = head[:, L:2 * L]
            # numerically-stable softplus(v) + 1e-8
            dec_var = (jnp.maximum(v, 0.0)
                       + jnp.log1p(jnp.exp(-jnp.abs(v))) + 1e-8)

            # Posterior combine (precision weighting) + reparameterized sample
            # for the next block -- fused, never leaves the kernel.
            prec_enc = 1.0 / evar_ref[...]
            prec_dec = 1.0 / dec_var
            q_var = 1.0 / (prec_enc + prec_dec)
            q_mu = (emu_ref[...] * prec_enc + dec_mu * prec_dec) * q_var

            pieces = [dec_mu, dec_var, q_mu, q_var]
            pad = pack_widths[i] - 4 * L
            if pad:
                pieces.append(jnp.zeros((dec_mu.shape[0], pad), jnp.float32))
            out_refs[i][...] = jnp.concatenate(pieces, axis=-1)  # dense store

            z = q_mu + jnp.sqrt(q_var) * eps_ref[...]

        # Final ConvTransposeBlock (final_layer=True, act='tanh').
        fcw_ref, fcb_ref, ctk_ref, ctb_ref = in_refs[11 * nblocks:]
        a_fc = slopes_ref[2 * nblocks]
        x = jnp.dot(z.astype(jnp.bfloat16), fcw_ref[...],
                    preferred_element_type=jnp.float32) + fcb_ref[...]
        x = jnp.where(x >= 0.0, x, a_fc * x)
        y = jnp.dot(x.astype(jnp.bfloat16), ctk_ref[...],
                    preferred_element_type=jnp.float32) + ctb_ref[...]
        out_refs[nblocks][...] = jnp.tanh(y)

    return kernel


# ---------------------- hoisted parameter re-layout (prep) -------------------

def _prep_conv_pack(p, in_ch, out_ch, img_size, final_layer, pad_cols_to=None):
    """Build matmul-ready operands ONCE (hoisted out of the forward path)."""
    H, W = img_size
    S = H * W
    N = out_ch * 4 * S
    # ctK[(ci, i, j), (co, 2i+di, 2j+dj)] = ct_w[ci, co, di, dj]
    #   rows: fc-output order (ci, i, j);  cols: NCHW flatten order.
    eye_h = jnp.eye(H, dtype=jnp.float32)
    eye_w = jnp.eye(W, dtype=jnp.float32)
    ctK = jnp.einsum("ckde,ip,jq->cijkpdqe", p["ct_w"], eye_h, eye_w)
    ctK = ctK.reshape(in_ch * S, N)
    ct_bK = jnp.repeat(p["ct_b"], 4 * S).reshape(1, N)
    if pad_cols_to is not None and pad_cols_to > N:
        ctK = jnp.pad(ctK, ((0, 0), (0, pad_cols_to - N)))
        ct_bK = jnp.pad(ct_bK, ((0, 0), (0, pad_cols_to - N)))
    pack = {
        "fc_w": p["fc_w"].astype(jnp.bfloat16),
        "fc_b": p["fc_b"].reshape(1, -1).astype(jnp.float32),
        "ctK": ctK.astype(jnp.bfloat16),
        "ct_bK": ct_bK.astype(jnp.float32),
        "prelu_fc": jnp.asarray(p["prelu_fc"], jnp.float32),
        "prelu_conv": jnp.asarray(p["prelu_conv"], jnp.float32),
    }
    if not final_layer:
        # Factored channel indicator: G (N, C), G^T (C, N)  (was dense N x N).
        G = jnp.repeat(jnp.eye(out_ch, dtype=jnp.float32), 4 * S, axis=0)
        pack["G"] = G
        pack["GT"] = jnp.transpose(G)
    return pack


def prepare_decoder_params(params):
    prepped = {"blocks": [], "meta": params["meta"],
               "final_meta": params["final_meta"]}
    slopes = []
    for (in_ch, out_ch, im), blk in zip(params["meta"], params["blocks"]):
        pack = _prep_conv_pack(blk["conv"], in_ch, out_ch, im, final_layer=False)
        lout = blk["fc_mean_w"].shape[1]
        pack["w_head"] = jnp.concatenate(
            [blk["fc_mean_w"], blk["fc_var_w"]], axis=1).astype(jnp.bfloat16)
        pack["b_head"] = jnp.concatenate(
            [blk["fc_mean_b"], blk["fc_var_b"]]).reshape(1, -1).astype(jnp.float32)
        pack["lout"] = int(lout)
        slopes.append(pack.pop("prelu_fc"))
        slopes.append(pack.pop("prelu_conv"))
        prepped["blocks"].append(pack)

    in_ch, out_ch, im = params["final_meta"]
    Nf = out_ch * 4 * im[0] * im[1]
    Nf_pad = _round_up(Nf, _LANE)
    fpack = _prep_conv_pack(params["final"], in_ch, out_ch, im,
                            final_layer=True, pad_cols_to=Nf_pad)
    slopes.append(fpack.pop("prelu_fc"))
    fpack.pop("prelu_conv")
    prepped["final"] = fpack
    prepped["final_n"] = Nf
    prepped["final_n_pad"] = Nf_pad
    prepped["slopes"] = jnp.stack(slopes)       # all PReLU slopes -> SMEM
    return prepped


# ------------------------- fused forward (one pallas_call) -------------------

def decoder_fwd(prepped, h_list, mu_list, var_list, bottle_neck, key):
    del h_list          # Decoder.forward zips h but never uses it
    mu_r, var_r = mu_list[::-1], var_list[::-1]
    blocks = prepped["blocks"]
    nb = len(blocks)
    B = bottle_neck.shape[0]

    # Pre-draw reparameterization noise with the SAME key-splitting order the
    # reference uses (jax.random.normal depends only on key/shape/dtype).
    eps_list = []
    for i in range(nb):
        key, sub = jax.random.split(key)
        eps_list.append(jax.random.normal(sub, (B, blocks[i]["lout"]),
                                          jnp.float32))

    louts = tuple(blk["lout"] for blk in blocks)
    pack_widths = tuple(_round_up(4 * l, _LANE) for l in louts)
    inv_ns = tuple(1.0 / float(B * 4 * im[0] * im[1])
                   for (_, _, im) in prepped["meta"])

    kernel = _build_fused_decoder_kernel(nb, louts, inv_ns, pack_widths,
                                         _BN_EPS)

    inputs = [prepped["slopes"], bottle_neck]
    in_specs = [_SMEM_SPEC, _full(bottle_neck.shape)]
    for i, blk in enumerate(blocks):
        ops = [mu_r[i], var_r[i], eps_list[i], blk["fc_w"], blk["fc_b"],
               blk["ctK"], blk["ct_bK"], blk["G"], blk["GT"],
               blk["w_head"], blk["b_head"]]
        inputs += ops
        in_specs += [_full(o.shape) for o in ops]
    fin = prepped["final"]
    fops = [fin["fc_w"], fin["fc_b"], fin["ctK"], fin["ct_bK"]]
    inputs += fops
    in_specs += [_full(o.shape) for o in fops]

    out_shape = tuple(jax.ShapeDtypeStruct((B, w), jnp.float32)
                      for w in pack_widths)
    out_shape += (jax.ShapeDtypeStruct((B, prepped["final_n_pad"]),
                                       jnp.float32),)
    out_specs = tuple(_full((B, w)) for w in pack_widths)
    out_specs += (_full((B, prepped["final_n_pad"])),)

    outs = pl.pallas_call(
        kernel,
        out_shape=out_shape,
        grid=(1,),
        in_specs=in_specs,
        out_specs=out_specs,
        compiler_params=pltpu.CompilerParams(
            dimension_semantics=("arbitrary",),
            vmem_limit_bytes=_VMEM_LIMIT_BYTES),
    )(*inputs)

    dec_mu_list, dec_var_list, q_mu_list, q_var_list = [], [], [], []
    for i in range(nb):
        L = louts[i]
        p = outs[i]
        dec_mu_list.append(p[:, 0:L])
        dec_var_list.append(p[:, L:2 * L])
        q_mu_list.append(p[:, 2 * L:3 * L])
        q_var_list.append(p[:, 3 * L:4 * L])

    _, out_ch_f, (Hf, Wf) = prepped["final_meta"]
    x_rec = outs[nb][:, :prepped["final_n"]].reshape(B, out_ch_f, 2 * Hf, 2 * Wf)
    return x_rec, dec_mu_list, dec_var_list, q_mu_list, q_var_list


# -------------------- pure-JAX reference (independent path) -----------------

def sample_gaussian(key, mu, var):
    return mu + jnp.sqrt(var) * jax.random.normal(key, mu.shape, mu.dtype)


def _ref_conv_block(p, z, in_ch, out_ch, img_size, act, final_layer):
    B = z.shape[0]
    H, W = img_size
    hp = jax.lax.Precision.HIGHEST
    x = jnp.dot(z, p["fc_w"], precision=hp) + p["fc_b"]
    x = jnp.where(x >= 0.0, x, p["prelu_fc"] * x)
    x = x.reshape(B, in_ch, H, W)
    x_flat = x.transpose(0, 2, 3, 1).reshape(B * H * W, in_ch)
    w_m = p["ct_w"].transpose(0, 2, 3, 1).reshape(in_ch, 4 * out_ch)
    b_m = jnp.tile(p["ct_b"], 4)
    y = jnp.dot(x_flat, w_m, precision=hp) + b_m
    y = y.reshape(B, H, W, 2, 2, out_ch).transpose(0, 5, 1, 3, 2, 4)
    y = y.reshape(B, out_ch, 2 * H, 2 * W)
    if not final_layer:
        mean = jnp.mean(y, axis=(0, 2, 3), keepdims=True)
        var = jnp.mean((y - mean) ** 2, axis=(0, 2, 3), keepdims=True)
        y = (y - mean) * jax.lax.rsqrt(var + _BN_EPS)
        y = jnp.where(y >= 0.0, y, p["prelu_conv"] * y)
    if act == "tanh":
        y = jnp.tanh(y)
    return y


def _ref_decoder_block(p, z, in_ch, out_ch, img_size):
    B = z.shape[0]
    hp = jax.lax.Precision.HIGHEST
    h = _ref_conv_block(p["conv"], z, in_ch, out_ch, img_size, "prelu", False)
    h_flat = h.reshape(B, -1)
    mu = jnp.dot(h_flat, p["fc_mean_w"], precision=hp) + p["fc_mean_b"]
    v = jnp.dot(h_flat, p["fc_var_w"], precision=hp) + p["fc_var_b"]
    var = jnp.maximum(v, 0.0) + jnp.log1p(jnp.exp(-jnp.abs(v))) + 1e-8
    return h, mu, var


def ref_decoder_fwd(params, h_list, mu_list, var_list, bottle_neck, key):
    h_r, mu_r, var_r = h_list[::-1], mu_list[::-1], var_list[::-1]
    dec_mu_list, dec_var_list, q_mu_list, q_var_list = [], [], [], []
    q_mu = q_var = None
    for i, (_h, _mu, _var) in enumerate(zip(h_r, mu_r, var_r)):
        if i == 0:
            z = bottle_neck
        else:
            key, sub = jax.random.split(key)
            z = sample_gaussian(sub, q_mu, q_var)
        in_ch, out_ch, im = params["meta"][i]
        _, dec_mu, dec_var = _ref_decoder_block(params["blocks"][i], z,
                                                in_ch, out_ch, im)
        prec_enc = 1.0 / _var
        prec_dec = 1.0 / dec_var
        q_mu = (_mu * prec_enc + dec_mu * prec_dec) / (prec_enc + prec_dec)
        q_var = 1.0 / (prec_enc + prec_dec)
        dec_mu_list.append(dec_mu)
        dec_var_list.append(dec_var)
        q_mu_list.append(q_mu)
        q_var_list.append(q_var)
    key, sub = jax.random.split(key)
    z = sample_gaussian(sub, q_mu, q_var)
    in_ch, out_ch, im = params["final_meta"]
    x_rec = _ref_conv_block(params["final"], z, in_ch, out_ch, im, "tanh", True)
    return x_rec, dec_mu_list, dec_var_list, q_mu_list, q_var_list


# ----------------------------- parameter init ------------------------------

def init_conv_transpose_block(key, in_latent, in_ch, out_ch, img_size):
    H, W = img_size
    ks = jax.random.split(key, 4)
    fc_out = in_ch * H * W
    return {
        "fc_w": 0.1 * jax.random.normal(ks[0], (in_latent, fc_out), jnp.float32),
        "fc_b": 0.01 * jax.random.normal(ks[1], (fc_out,), jnp.float32),
        "prelu_fc": jnp.float32(0.25),            # nn.PReLU default init
        "ct_w": 0.1 * jax.random.normal(ks[2], (in_ch, out_ch, 2, 2), jnp.float32),
        "ct_b": 0.01 * jax.random.normal(ks[3], (out_ch,), jnp.float32),
        "prelu_conv": jnp.float32(0.25),
    }


def init_decoder_block(key, in_latent, out_latent, in_ch, out_ch, img_size):
    H, W = img_size
    k1, k2, k3, k4, k5 = jax.random.split(key, 5)
    feat = out_ch * 2 * H * 2 * W
    return {
        "conv": init_conv_transpose_block(k1, in_latent, in_ch, out_ch, img_size),
        "fc_mean_w": 0.1 * jax.random.normal(k2, (feat, out_latent), jnp.float32),
        "fc_mean_b": 0.01 * jax.random.normal(k3, (out_latent,), jnp.float32),
        "fc_var_w": 0.1 * jax.random.normal(k4, (feat, out_latent), jnp.float32),
        "fc_var_b": 0.01 * jax.random.normal(k5, (out_latent,), jnp.float32),
    }


def init_decoder(key, latent, channels, img_size):
    params = {"blocks": [], "meta": []}
    _h, _w = img_size
    keys = jax.random.split(key, len(channels) - 1)
    for i in range(len(channels) - 2):
        params["blocks"].append(
            init_decoder_block(keys[i], latent[i], latent[i + 1],
                               channels[i], channels[i + 1], (_h, _w)))
        params["meta"].append((channels[i], channels[i + 1], (_h, _w)))
        _h, _w = _h * 2, _w * 2
    params["final"] = init_conv_transpose_block(
        keys[-1], latent[-1], channels[-2], channels[-1], (_h, _w))
    params["final_meta"] = (channels[-2], channels[-1], (_h, _w))
    return params


# ----------------------------------- main -----------------------------------

if __name__ == "__main__":
    channels = [4, 4, 3, 1]      # two DecoderBlocks + one final ConvTransposeBlock
    latent = [16, 8, 8]
    img_size = (2, 2)
    B = 2

    key = jax.random.PRNGKey(0)
    k_params, k_inputs, k_noise = jax.random.split(key, 3)
    params = init_decoder(k_params, latent, channels, img_size)
    prepped = prepare_decoder_params(params)    # hoisted weight re-layout

    nblocks = len(channels) - 2
    # after in-forward reversal, step i pairs with a latent of dim latent[i+1]
    dims_rev = [latent[i + 1] for i in range(nblocks)]
    kin = jax.random.split(k_inputs, 3 * nblocks + 1)
    mu_rev = [jax.random.normal(kin[j], (B, d), jnp.float32)
              for j, d in enumerate(dims_rev)]
    var_rev = [jax.nn.softplus(jax.random.normal(kin[nblocks + j], (B, d),
                                                 jnp.float32)) + 1e-3
               for j, d in enumerate(dims_rev)]
    h_rev = [jax.random.normal(kin[2 * nblocks + j], (B, d), jnp.float32)
             for j, d in enumerate(dims_rev)]
    # forward() reverses its list inputs, so hand them over in encoder order
    mu_list, var_list, h_list = mu_rev[::-1], var_rev[::-1], h_rev[::-1]
    bottle_neck = jax.random.normal(kin[-1], (B, latent[0]), jnp.float32)

    fwd = jax.jit(lambda h, m, v, bn, k: decoder_fwd(prepped, h, m, v, bn, k))
    x_rec, dec_mu_list, dec_var_list, q_mu_list, q_var_list = fwd(
        h_list, mu_list, var_list, bottle_neck, k_noise)

    jax.block_until_ready(x_rec)
    for t in dec_mu_list + dec_var_list + q_mu_list + q_var_list:
        jax.block_until_ready(t)

    # structural checks
    final_hw = img_size[0] * 2 ** (len(channels) - 1)
    assert x_rec.shape == (B, channels[-1], final_hw, final_hw)
    assert all(m.shape == (B, latent[i + 1]) for i, m in enumerate(dec_mu_list))
    assert all(bool(jnp.all(v > 0)) for v in dec_var_list + q_var_list)

    # numerical check against an independent pure-JAX reference of the same
    # forward pass (same key usage -> identical Gaussian noise draws)
    x_ref, dmu_ref, dvar_ref, qmu_ref, qvar_ref = ref_decoder_fwd(
        params, h_list, mu_list, var_list, bottle_neck, k_noise)
    assert bool(jnp.allclose(x_rec, x_ref, rtol=5e-2, atol=5e-2))
    for a, b in zip(dec_mu_list + dec_var_list + q_mu_list + q_var_list,
                    dmu_ref + dvar_ref + qmu_ref + qvar_ref):
        assert bool(jnp.allclose(a, b, rtol=5e-2, atol=5e-2))

    print("KERNEL_OK")
</pallas_src>

<mosaic_0001>
module attributes {stable_mosaic.version = 11 : i64} {
  func.func @kernel(%arg0: i32, %arg1: memref<5xf32, #tpu.memory_space<smem>>, %arg2: memref<2x16xf32, #tpu.memory_space<vmem>>, %arg3: memref<2x8xf32, #tpu.memory_space<vmem>>, %arg4: memref<2x8xf32, #tpu.memory_space<vmem>>, %arg5: memref<2x8xf32, #tpu.memory_space<vmem>>, %arg6: memref<16x16xbf16, #tpu.memory_space<vmem>>, %arg7: memref<1x16xf32, #tpu.memory_space<vmem>>, %arg8: memref<16x64xbf16, #tpu.memory_space<vmem>>, %arg9: memref<1x64xf32, #tpu.memory_space<vmem>>, %arg10: memref<64x4xf32, #tpu.memory_space<vmem>>, %arg11: memref<4x64xf32, #tpu.memory_space<vmem>>, %arg12: memref<64x16xbf16, #tpu.memory_space<vmem>>, %arg13: memref<1x16xf32, #tpu.memory_space<vmem>>, %arg14: memref<2x8xf32, #tpu.memory_space<vmem>>, %arg15: memref<2x8xf32, #tpu.memory_space<vmem>>, %arg16: memref<2x8xf32, #tpu.memory_space<vmem>>, %arg17: memref<8x64xbf16, #tpu.memory_space<vmem>>, %arg18: memref<1x64xf32, #tpu.memory_space<vmem>>, %arg19: memref<64x192xbf16, #tpu.memory_space<vmem>>, %arg20: memref<1x192xf32, #tpu.memory_space<vmem>>, %arg21: memref<192x3xf32, #tpu.memory_space<vmem>>, %arg22: memref<3x192xf32, #tpu.memory_space<vmem>>, %arg23: memref<192x16xbf16, #tpu.memory_space<vmem>>, %arg24: memref<1x16xf32, #tpu.memory_space<vmem>>, %arg25: memref<8x192xbf16, #tpu.memory_space<vmem>>, %arg26: memref<1x192xf32, #tpu.memory_space<vmem>>, %arg27: memref<192x256xbf16, #tpu.memory_space<vmem>>, %arg28: memref<1x256xf32, #tpu.memory_space<vmem>>, %arg29: memref<2x128xf32, #tpu.memory_space<vmem>>, %arg30: memref<2x128xf32, #tpu.memory_space<vmem>>, %arg31: memref<2x256xf32, #tpu.memory_space<vmem>>) attributes {dimension_semantics = [#tpu.dimension_semantics<arbitrary>], iteration_bounds = array<i64: 1>, scalar_prefetch = 0 : i64, scratch_operands = 0 : i64, tpu.core_type = #tpu.core_type<tc>, window_params = [{transform_indices = @transform_0, window_bounds = array<i64: 5>}, {pipeline_mode = #tpu.pipeline_mode<synchronous>, transform_indices = @transform_1, window_bounds = array<i64: 2, 16>}, {pipeline_mode = #tpu.pipeline_mode<synchronous>, transform_indices = @transform_2, window_bounds = array<i64: 2, 8>}, {pipeline_mode = #tpu.pipeline_mode<synchronous>, transform_indices = @transform_3, window_bounds = array<i64: 2, 8>}, {pipeline_mode = #tpu.pipeline_mode<synchronous>, transform_indices = @transform_4, window_bounds = array<i64: 2, 8>}, {pipeline_mode = #tpu.pipeline_mode<synchronous>, transform_indices = @transform_5, window_bounds = array<i64: 16, 16>}, {pipeline_mode = #tpu.pipeline_mode<synchronous>, transform_indices = @transform_6, window_bounds = array<i64: 1, 16>}, {pipeline_mode = #tpu.pipeline_mode<synchronous>, transform_indices = @transform_7, window_bounds = array<i64: 16, 64>}, {pipeline_mode = #tpu.pipeline_mode<synchronous>, transform_indices = @transform_8, window_bounds = array<i64: 1, 64>}, {pipeline_mode = #tpu.pipeline_mode<synchronous>, transform_indices = @transform_9, window_bounds = array<i64: 64, 4>}, {pipeline_mode = #tpu.pipeline_mode<synchronous>, transform_indices = @transform_10, window_bounds = array<i64: 4, 64>}, {pipeline_mode = #tpu.pipeline_mode<synchronous>, transform_indices = @transform_11, window_bounds = array<i64: 64, 16>}, {pipeline_mode = #tpu.pipeline_mode<synchronous>, transform_indices = @transform_12, window_bounds = array<i64: 1, 16>}, {pipeline_mode = #tpu.pipeline_mode<synchronous>, transform_indices = @transform_13, window_bounds = array<i64: 2, 8>}, {pipeline_mode = #tpu.pipeline_mode<synchronous>, transform_indices = @transform_14, window_bounds = array<i64: 2, 8>}, {pipeline_mode = #tpu.pipeline_mode<synchronous>, transform_indices = @transform_15, window_bounds = array<i64: 2, 8>}, {pipeline_mode = #tpu.pipeline_mode<synchronous>, transform_indices = @transform_16, window_bounds = array<i64: 8, 64>}, {pipeline_mode = #tpu.pipeline_mode<synchronous>, transform_indices = @transform_17, window_bounds = array<i64: 1, 64>}, {pipeline_mode = #tpu.pipeline_mode<synchronous>, transform_indices = @transform_18, window_bounds = array<i64: 64, 192>}, {pipeline_mode = #tpu.pipeline_mode<synchronous>, transform_indices = @transform_19, window_bounds = array<i64: 1, 192>}, {pipeline_mode = #tpu.pipeline_mode<synchronous>, transform_indices = @transform_20, window_bounds = array<i64: 192, 3>}, {pipeline_mode = #tpu.pipeline_mode<synchronous>, transform_indices = @transform_21, window_bounds = array<i64: 3, 192>}, {pipeline_mode = #tpu.pipeline_mode<synchronous>, transform_indices = @transform_22, window_bounds = array<i64: 192, 16>}, {pipeline_mode = #tpu.pipeline_mode<synchronous>, transform_indices = @transform_23, window_bounds = array<i64: 1, 16>}, {pipeline_mode = #tpu.pipeline_mode<synchronous>, transform_indices = @transform_24, window_bounds = array<i64: 8, 192>}, {pipeline_mode = #tpu.pipeline_mode<synchronous>, transform_indices = @transform_25, window_bounds = array<i64: 1, 192>}, {pipeline_mode = #tpu.pipeline_mode<synchronous>, transform_indices = @transform_26, window_bounds = array<i64: 192, 256>}, {pipeline_mode = #tpu.pipeline_mode<synchronous>, transform_indices = @transform_27, window_bounds = array<i64: 1, 256>}, {pipeline_mode = #tpu.pipeline_mode<synchronous>, transform_indices = @transform_28, window_bounds = array<i64: 2, 128>}, {pipeline_mode = #tpu.pipeline_mode<synchronous>, transform_indices = @transform_29, window_bounds = array<i64: 2, 128>}, {pipeline_mode = #tpu.pipeline_mode<synchronous>, transform_indices = @transform_30, window_bounds = array<i64: 2, 256>}]} {
    %c0 = arith.constant 0 : index
    %c0_0 = arith.constant 0 : index
    %0 = vector.load %arg2[%c0, %c0_0] : memref<2x16xf32, #tpu.memory_space<vmem>>, vector<2x16xf32>
    %c0_1 = arith.constant 0 : index
    %1 = memref.load %arg1[%c0_1] : memref<5xf32, #tpu.memory_space<smem>>
    %c1 = arith.constant 1 : index
    %2 = memref.load %arg1[%c1] : memref<5xf32, #tpu.memory_space<smem>>
    %3 = arith.truncf %0 : vector<2x16xf32> to vector<2x16xbf16>
    %c0_2 = arith.constant 0 : index
    %c0_3 = arith.constant 0 : index
    %4 = vector.load %arg6[%c0_2, %c0_3] : memref<16x16xbf16, #tpu.memory_space<vmem>>, vector<16x16xbf16>
    %cst = arith.constant dense<0.000000e+00> : vector<2x16xf32>
    %5 = tpu.matmul %3, %4, %cst {dimension_numbers = #tpu.dot_dimension_numbers<[1], [0], [0], [1], [0, 0, 1, 1], [], []>} : vector<2x16xbf16>, vector<16x16xbf16>, vector<2x16xf32> -> vector<2x16xf32>
    %c0_4 = arith.constant 0 : index
    %c0_5 = arith.constant 0 : index
    %6 = vector.load %arg7[%c0_4, %c0_5] : memref<1x16xf32, #tpu.memory_space<vmem>>, vector<1x16xf32>
    %7 = vector.broadcast %6 : vector<1x16xf32> to vector<2x16xf32>
    %8 = arith.addf %5, %7 : vector<2x16xf32>
    %cst_6 = arith.constant 0.000000e+00 : f32
    %9 = vector.broadcast %cst_6 : f32 to vector<2x16xf32>
    %10 = arith.cmpf oge, %8, %9 : vector<2x16xf32>
    %11 = vector.broadcast %1 : f32 to vector<2x16xf32>
    %12 = arith.mulf %11, %8 : vector<2x16xf32>
    %13 = arith.select %10, %8, %12 : vector<2x16xi1>, vector<2x16xf32>
    %14 = arith.truncf %13 : vector<2x16xf32> to vector<2x16xbf16>
    %c0_7 = arith.constant 0 : index
    %c0_8 = arith.constant 0 : index
    %15 = vector.load %arg8[%c0_7, %c0_8] : memref<16x64xbf16, #tpu.memory_space<vmem>>, vector<16x64xbf16>
    %cst_9 = arith.constant dense<0.000000e+00> : vector<2x64xf32>
    %16 = tpu.matmul %14, %15, %cst_9 {dimension_numbers = #tpu.dot_dimension_numbers<[1], [0], [0], [1], [0, 0, 1, 1], [], []>} : vector<2x16xbf16>, vector<16x64xbf16>, vector<2x64xf32> -> vector<2x64xf32>
    %c0_10 = arith.constant 0 : index
    %c0_11 = arith.constant 0 : index
    %17 = vector.load %arg9[%c0_10, %c0_11] : memref<1x64xf32, #tpu.memory_space<vmem>>, vector<1x64xf32>
    %18 = vector.broadcast %17 : vector<1x64xf32> to vector<2x64xf32>
    %19 = arith.addf %16, %18 : vector<2x64xf32>
    %cst_12 = arith.constant dense<0.000000e+00> : vector<64xf32>
    %20 = vector.multi_reduction <add>, %19, %cst_12 [0] : vector<2x64xf32> to vector<64xf32>
    %21 = vector.shape_cast %20 : vector<64xf32> to vector<1x64xf32>
    %22 = arith.mulf %19, %19 : vector<2x64xf32>
    %cst_13 = arith.constant dense<0.000000e+00> : vector<64xf32>
    %23 = vector.multi_reduction <add>, %22, %cst_13 [0] : vector<2x64xf32> to vector<64xf32>
    %24 = vector.shape_cast %23 : vector<64xf32> to vector<1x64xf32>
    %25 = tpu.concatenate %21, %24 in 0 : vector<1x64xf32>, vector<1x64xf32> -> vector<2x64xf32>
    %c0_14 = arith.constant 0 : index
    %c0_15 = arith.constant 0 : index
    %26 = vector.load %arg10[%c0_14, %c0_15] : memref<64x4xf32, #tpu.memory_space<vmem>>, vector<64x4xf32>
    %cst_16 = arith.constant dense<0.000000e+00> : vector<2x4xf32>
    %27 = tpu.matmul %25, %26, %cst_16 {dimension_numbers = #tpu.dot_dimension_numbers<[1], [0], [0], [1], [0, 0, 1, 1], [], []>} : vector<2x64xf32>, vector<64x4xf32>, vector<2x4xf32> -> vector<2x4xf32>
    %cst_17 = arith.constant 3.125000e-02 : f32
    %28 = vector.broadcast %cst_17 : f32 to vector<2x4xf32>
    %29 = arith.mulf %27, %28 : vector<2x4xf32>
    %c0_18 = arith.constant 0 : index
    %c0_19 = arith.constant 0 : index
    %30 = vector.load %arg11[%c0_18, %c0_19] : memref<4x64xf32, #tpu.memory_space<vmem>>, vector<4x64xf32>
    %cst_20 = arith.constant dense<0.000000e+00> : vector<2x64xf32>
    %31 = tpu.matmul %29, %30, %cst_20 {dimension_numbers = #tpu.dot_dimension_numbers<[1], [0], [0], [1], [0, 0, 1, 1], [], []>} : vector<2x4xf32>, vector<4x64xf32>, vector<2x64xf32> -> vector<2x64xf32>
    %32 = vector.extract_strided_slice %31 {offsets = [0, 0], sizes = [1, 64], strides = [1, 1]} : vector<2x64xf32> to vector<1x64xf32>
    %33 = vector.extract_strided_slice %31 {offsets = [1, 0], sizes = [1, 64], strides = [1, 1]} : vector<2x64xf32> to vector<1x64xf32>
    %34 = arith.mulf %32, %32 : vector<1x64xf32>
    %35 = arith.subf %33, %34 : vector<1x64xf32>
    %cst_21 = arith.constant 0.000000e+00 : f32
    %36 = vector.broadcast %cst_21 : f32 to vector<1x64xf32>
    %37 = arith.maximumf %35, %36 : vector<1x64xf32>
    %38 = vector.broadcast %32 : vector<1x64xf32> to vector<2x64xf32>
    %39 = arith.subf %19, %38 : vector<2x64xf32>
    %cst_22 = arith.constant 9.99999974E-6 : f32
    %40 = vector.broadcast %cst_22 : f32 to vector<1x64xf32>
    %41 = arith.addf %37, %40 : vector<1x64xf32>
    %42 = math.rsqrt %41 : vector<1x64xf32>
    %43 = vector.broadcast %42 : vector<1x64xf32> to vector<2x64xf32>
    %44 = arith.mulf %39, %43 : vector<2x64xf32>
    %cst_23 = arith.constant 0.000000e+00 : f32
    %45 = vector.broadcast %cst_23 : f32 to vector<2x64xf32>
    %46 = arith.cmpf oge, %44, %45 : vector<2x64xf32>
    %47 = vector.broadcast %2 : f32 to vector<2x64xf32>
    %48 = arith.mulf %47, %44 : vector<2x64xf32>
    %49 = arith.select %46, %44, %48 : vector<2x64xi1>, vector<2x64xf32>
    %50 = arith.truncf %49 : vector<2x64xf32> to vector<2x64xbf16>
    %c0_24 = arith.constant 0 : index
    %c0_25 = arith.constant 0 : index
    %51 = vector.load %arg12[%c0_24, %c0_25] : memref<64x16xbf16, #tpu.memory_space<vmem>>, vector<64x16xbf16>
    %cst_26 = arith.constant dense<0.000000e+00> : vector<2x16xf32>
    %52 = tpu.matmul %50, %51, %cst_26 {dimension_numbers = #tpu.dot_dimension_numbers<[1], [0], [0], [1], [0, 0, 1, 1], [], []>} : vector<2x64xbf16>, vector<64x16xbf16>, vector<2x16xf32> -> vector<2x16xf32>
    %c0_27 = arith.constant 0 : index
    %c0_28 = arith.constant 0 : index
    %53 = vector.load %arg13[%c0_27, %c0_28] : memref<1x16xf32, #tpu.memory_space<vmem>>, vector<1x16xf32>
    %54 = vector.broadcast %53 : vector<1x16xf32> to vector<2x16xf32>
    %55 = arith.addf %52, %54 : vector<2x16xf32>
    %56 = vector.extract_strided_slice %55 {offsets = [0, 0], sizes = [2, 8], strides = [1, 1]} : vector<2x16xf32> to vector<2x8xf32>
    %57 = vector.extract_strided_slice %55 {offsets = [0, 8], sizes = [2, 8], strides = [1, 1]} : vector<2x16xf32> to vector<2x8xf32>
    %cst_29 = arith.constant 0.000000e+00 : f32
    %58 = vector.broadcast %cst_29 : f32 to vector<2x8xf32>
    %59 = arith.maximumf %57, %58 : vector<2x8xf32>
    %60 = math.absf %57 : vector<2x8xf32>
    %cst_30 = arith.constant 0.000000e+00 : f32
    %61 = vector.broadcast %cst_30 : f32 to vector<2x8xf32>
    %62 = arith.subf %61, %60 : vector<2x8xf32>
    %63 = math.exp %62 : vector<2x8xf32>
    %64 = math.log1p %63 : vector<2x8xf32>
    %65 = arith.addf %59, %64 : vector<2x8xf32>
    %cst_31 = arith.constant 9.99999993E-9 : f32
    %66 = vector.broadcast %cst_31 : f32 to vector<2x8xf32>
    %67 = arith.addf %65, %66 : vector<2x8xf32>
    %c0_32 = arith.constant 0 : index
    %c0_33 = arith.constant 0 : index
    %68 = vector.load %arg4[%c0_32, %c0_33] : memref<2x8xf32, #tpu.memory_space<vmem>>, vector<2x8xf32>
    %cst_34 = arith.constant 1.000000e+00 : f32
    %69 = vector.broadcast %cst_34 : f32 to vector<2x8xf32>
    %70 = arith.divf %69, %68 : vector<2x8xf32>
    %cst_35 = arith.constant 1.000000e+00 : f32
    %71 = vector.broadcast %cst_35 : f32 to vector<2x8xf32>
    %72 = arith.divf %71, %67 : vector<2x8xf32>
    %73 = arith.addf %70, %72 : vector<2x8xf32>
    %cst_36 = arith.constant 1.000000e+00 : f32
    %74 = vector.broadcast %cst_36 : f32 to vector<2x8xf32>
    %75 = arith.divf %74, %73 : vector<2x8xf32>
    %c0_37 = arith.constant 0 : index
    %c0_38 = arith.constant 0 : index
    %76 = vector.load %arg3[%c0_37, %c0_38] : memref<2x8xf32, #tpu.memory_space<vmem>>, vector<2x8xf32>
    %77 = arith.mulf %76, %70 : vector<2x8xf32>
    %78 = arith.mulf %56, %72 : vector<2x8xf32>
    %79 = arith.addf %77, %78 : vector<2x8xf32>
    %80 = arith.mulf %79, %75 : vector<2x8xf32>
    %cst_39 = arith.constant 0.000000e+00 : f32
    %81 = vector.broadcast %cst_39 : f32 to vector<2x96xf32>
    %82 = tpu.concatenate %56, %67, %80, %75, %81 in 1 : vector<2x8xf32>, vector<2x8xf32>, vector<2x8xf32>, vector<2x8xf32>, vector<2x96xf32> -> vector<2x128xf32>
    %c0_40 = arith.constant 0 : index
    %c0_41 = arith.constant 0 : index
    %83 = vector.load %arg29[%c0_40, %c0_41] : memref<2x128xf32, #tpu.memory_space<vmem>>, vector<2x128xf32>
    tpu.vector_store %arg29[%c0_40, %c0_41], %82 {strides = array<i32>} : memref<2x128xf32, #tpu.memory_space<vmem>>, vector<2x128xf32>,
    %84 = math.sqrt %75 : vector<2x8xf32>
    %c0_42 = arith.constant 0 : index
    %c0_43 = arith.constant 0 : index
    %85 = vector.load %arg5[%c0_42, %c0_43] : memref<2x8xf32, #tpu.memory_space<vmem>>, vector<2x8xf32>
    %86 = arith.mulf %84, %85 : vector<2x8xf32>
    %87 = arith.addf %80, %86 : vector<2x8xf32>
    %c2 = arith.constant 2 : index
    %88 = memref.load %arg1[%c2] : memref<5xf32, #tpu.memory_space<smem>>
    %c3 = arith.constant 3 : index
    %89 = memref.load %arg1[%c3] : memref<5xf32, #tpu.memory_space<smem>>
    %90 = arith.truncf %87 : vector<2x8xf32> to vector<2x8xbf16>
    %c0_44 = arith.constant 0 : index
    %c0_45 = arith.constant 0 : index
    %91 = vector.load %arg17[%c0_44, %c0_45] : memref<8x64xbf16, #tpu.memory_space<vmem>>, vector<8x64xbf16>
    %cst_46 = arith.constant dense<0.000000e+00> : vector<2x64xf32>
    %92 = tpu.matmul %90, %91, %cst_46 {dimension_numbers = #tpu.dot_dimension_numbers<[1], [0], [0], [1], [0, 0, 1, 1], [], []>} : vector<2x8xbf16>, vector<8x64xbf16>, vector<2x64xf32> -> vector<2x64xf32>
    %c0_47 = arith.constant 0 : index
    %c0_48 = arith.constant 0 : index
    %93 = vector.load %arg18[%c0_47, %c0_48] : memref<1x64xf32, #tpu.memory_space<vmem>>, vector<1x64xf32>
    %94 = vector.broadcast %93 : vector<1x64xf32> to vector<2x64xf32>
    %95 = arith.addf %92, %94 : vector<2x64xf32>
    %cst_49 = arith.constant 0.000000e+00 : f32
    %96 = vector.broadcast %cst_49 : f32 to vector<2x64xf32>
    %97 = arith.cmpf oge, %95, %96 : vector<2x64xf32>
    %98 = vector.broadcast %88 : f32 to vector<2x64xf32>
    %99 = arith.mulf %98, %95 : vector<2x64xf32>
    %100 = arith.select %97, %95, %99 : vector<2x64xi1>, vector<2x64xf32>
    %101 = arith.truncf %100 : vector<2x64xf32> to vector<2x64xbf16>
    %c0_50 = arith.constant 0 : index
    %c0_51 = arith.constant 0 : index
    %102 = vector.load %arg19[%c0_50, %c0_51] : memref<64x192xbf16, #tpu.memory_space<vmem>>, vector<64x192xbf16>
    %cst_52 = arith.constant dense<0.000000e+00> : vector<2x192xf32>
    %103 = tpu.matmul %101, %102, %cst_52 {dimension_numbers = #tpu.dot_dimension_numbers<[1], [0], [0], [1], [0, 0, 1, 1], [], []>} : vector<2x64xbf16>, vector<64x192xbf16>, vector<2x192xf32> -> vector<2x192xf32>
    %c0_53 = arith.constant 0 : index
    %c0_54 = arith.constant 0 : index
    %104 = vector.load %arg20[%c0_53, %c0_54] : memref<1x192xf32, #tpu.memory_space<vmem>>, vector<1x192xf32>
    %105 = vector.broadcast %104 : vector<1x192xf32> to vector<2x192xf32>
    %106 = arith.addf %103, %105 : vector<2x192xf32>
    %cst_55 = arith.constant dense<0.000000e+00> : vector<192xf32>
    %107 = vector.multi_reduction <add>, %106, %cst_55 [0] : vector<2x192xf32> to vector<192xf32>
    %108 = vector.shape_cast %107 : vector<192xf32> to vector<1x192xf32>
    %109 = arith.mulf %106, %106 : vector<2x192xf32>
    %cst_56 = arith.constant dense<0.000000e+00> : vector<192xf32>
    %110 = vector.multi_reduction <add>, %109, %cst_56 [0] : vector<2x192xf32> to vector<192xf32>
    %111 = vector.shape_cast %110 : vector<192xf32> to vector<1x192xf32>
    %112 = tpu.concatenate %108, %111 in 0 : vector<1x192xf32>, vector<1x192xf32> -> vector<2x192xf32>
    %c0_57 = arith.constant 0 : index
    %c0_58 = arith.constant 0 : index
    %113 = vector.load %arg21[%c0_57, %c0_58] : memref<192x3xf32, #tpu.memory_space<vmem>>, vector<192x3xf32>
    %cst_59 = arith.constant dense<0.000000e+00> : vector<2x3xf32>
    %114 = tpu.matmul %112, %113, %cst_59 {dimension_numbers = #tpu.dot_dimension_numbers<[1], [0], [0], [1], [0, 0, 1, 1], [], []>} : vector<2x192xf32>, vector<192x3xf32>, vector<2x3xf32> -> vector<2x3xf32>
    %cst_60 = arith.constant 7.812500e-03 : f32
    %115 = vector.broadcast %cst_60 : f32 to vector<2x3xf32>
    %116 = arith.mulf %114, %115 : vector<2x3xf32>
    %c0_61 = arith.constant 0 : index
    %c0_62 = arith.constant 0 : index
    %117 = vector.load %arg22[%c0_61, %c0_62] : memref<3x192xf32, #tpu.memory_space<vmem>>, vector<3x192xf32>
    %cst_63 = arith.constant dense<0.000000e+00> : vector<2x192xf32>
    %118 = tpu.matmul %116, %117, %cst_63 {dimension_numbers = #tpu.dot_dimension_numbers<[1], [0], [0], [1], [0, 0, 1, 1], [], []>} : vector<2x3xf32>, vector<3x192xf32>, vector<2x192xf32> -> vector<2x192xf32>
    %119 = vector.extract_strided_slice %118 {offsets = [0, 0], sizes = [1, 192], strides = [1, 1]} : vector<2x192xf32> to vector<1x192xf32>
    %120 = vector.extract_strided_slice %118 {offsets = [1, 0], sizes = [1, 192], strides = [1, 1]} : vector<2x192xf32> to vector<1x192xf32>
    %121 = arith.mulf %119, %119 : vector<1x192xf32>
    %122 = arith.subf %120, %121 : vector<1x192xf32>
    %cst_64 = arith.constant 0.000000e+00 : f32
    %123 = vector.broadcast %cst_64 : f32 to vector<1x192xf32>
    %124 = arith.maximumf %122, %123 : vector<1x192xf32>
    %125 = vector.broadcast %119 : vector<1x192xf32> to vector<2x192xf32>
    %126 = arith.subf %106, %125 : vector<2x192xf32>
    %cst_65 = arith.constant 9.99999974E-6 : f32
    %127 = vector.broadcast %cst_65 : f32 to vector<1x192xf32>
    %128 = arith.addf %124, %127 : vector<1x192xf32>
    %129 = math.rsqrt %128 : vector<1x192xf32>
    %130 = vector.broadcast %129 : vector<1x192xf32> to vector<2x192xf32>
    %131 = arith.mulf %126, %130 : vector<2x192xf32>
    %cst_66 = arith.constant 0.000000e+00 : f32
    %132 = vector.broadcast %cst_66 : f32 to vector<2x192xf32>
    %133 = arith.cmpf oge, %131, %132 : vector<2x192xf32>
    %134 = vector.broadcast %89 : f32 to vector<2x192xf32>
    %135 = arith.mulf %134, %131 : vector<2x192xf32>
    %136 = arith.select %133, %131, %135 : vector<2x192xi1>, vector<2x192xf32>
    %137 = arith.truncf %136 : vector<2x192xf32> to vector<2x192xbf16>
    %c0_67 = arith.constant 0 : index
    %c0_68 = arith.constant 0 : index
    %138 = vector.load %arg23[%c0_67, %c0_68] : memref<192x16xbf16, #tpu.memory_space<vmem>>, vector<192x16xbf16>
    %cst_69 = arith.constant dense<0.000000e+00> : vector<2x16xf32>
    %139 = tpu.matmul %137, %138, %cst_69 {dimension_numbers = #tpu.dot_dimension_numbers<[1], [0], [0], [1], [0, 0, 1, 1], [], []>} : vector<2x192xbf16>, vector<192x16xbf16>, vector<2x16xf32> -> vector<2x16xf32>
    %c0_70 = arith.constant 0 : index
    %c0_71 = arith.constant 0 : index
    %140 = vector.load %arg24[%c0_70, %c0_71] : memref<1x16xf32, #tpu.memory_space<vmem>>, vector<1x16xf32>
    %141 = vector.broadcast %140 : vector<1x16xf32> to vector<2x16xf32>
    %142 = arith.addf %139, %141 : vector<2x16xf32>
    %143 = vector.extract_strided_slice %142 {offsets = [0, 0], sizes = [2, 8], strides = [1, 1]} : vector<2x16xf32> to vector<2x8xf32>
    %144 = vector.extract_strided_slice %142 {offsets = [0, 8], sizes = [2, 8], strides = [1, 1]} : vector<2x16xf32> to vector<2x8xf32>
    %cst_72 = arith.constant 0.000000e+00 : f32
    %145 = vector.broadcast %cst_72 : f32 to vector<2x8xf32>
    %146 = arith.maximumf %144, %145 : vector<2x8xf32>
    %147 = math.absf %144 : vector<2x8xf32>
    %cst_73 = arith.constant 0.000000e+00 : f32
    %148 = vector.broadcast %cst_73 : f32 to vector<2x8xf32>
    %149 = arith.subf %148, %147 : vector<2x8xf32>
    %150 = math.exp %149 : vector<2x8xf32>
    %151 = math.log1p %150 : vector<2x8xf32>
    %152 = arith.addf %146, %151 : vector<2x8xf32>
    %cst_74 = arith.constant 9.99999993E-9 : f32
    %153 = vector.broadcast %cst_74 : f32 to vector<2x8xf32>
    %154 = arith.addf %152, %153 : vector<2x8xf32>
    %c0_75 = arith.constant 0 : index
    %c0_76 = arith.constant 0 : index
    %155 = vector.load %arg15[%c0_75, %c0_76] : memref<2x8xf32, #tpu.memory_space<vmem>>, vector<2x8xf32>
    %cst_77 = arith.constant 1.000000e+00 : f32
    %156 = vector.broadcast %cst_77 : f32 to vector<2x8xf32>
    %157 = arith.divf %156, %155 : vector<2x8xf32>
    %cst_78 = arith.constant 1.000000e+00 : f32
    %158 = vector.broadcast %cst_78 : f32 to vector<2x8xf32>
    %159 = arith.divf %158, %154 : vector<2x8xf32>
    %160 = arith.addf %157, %159 : vector<2x8xf32>
    %cst_79 = arith.constant 1.000000e+00 : f32
    %161 = vector.broadcast %cst_79 : f32 to vector<2x8xf32>
    %162 = arith.divf %161, %160 : vector<2x8xf32>
    %c0_80 = arith.constant 0 : index
    %c0_81 = arith.constant 0 : index
    %163 = vector.load %arg14[%c0_80, %c0_81] : memref<2x8xf32, #tpu.memory_space<vmem>>, vector<2x8xf32>
    %164 = arith.mulf %163, %157 : vector<2x8xf32>
    %165 = arith.mulf %143, %159 : vector<2x8xf32>
    %166 = arith.addf %164, %165 : vector<2x8xf32>
    %167 = arith.mulf %166, %162 : vector<2x8xf32>
    %cst_82 = arith.constant 0.000000e+00 : f32
    %168 = vector.broadcast %cst_82 : f32 to vector<2x96xf32>
    %169 = tpu.concatenate %143, %154, %167, %162, %168 in 1 : vector<2x8xf32>, vector<2x8xf32>, vector<2x8xf32>, vector<2x8xf32>, vector<2x96xf32> -> vector<2x128xf32>
    %c0_83 = arith.constant 0 : index
    %c0_84 = arith.constant 0 : index
    %170 = vector.load %arg30[%c0_83, %c0_84] : memref<2x128xf32, #tpu.memory_space<vmem>>, vector<2x128xf32>
    tpu.vector_store %arg30[%c0_83, %c0_84], %169 {strides = array<i32>} : memref<2x128xf32, #tpu.memory_space<vmem>>, vector<2x128xf32>,
    %171 = math.sqrt %162 : vector<2x8xf32>
    %c0_85 = arith.constant 0 : index
    %c0_86 = arith.constant 0 : index
    %172 = vector.load %arg16[%c0_85, %c0_86] : memref<2x8xf32, #tpu.memory_space<vmem>>, vector<2x8xf32>
    %173 = arith.mulf %171, %172 : vector<2x8xf32>
    %174 = arith.addf %167, %173 : vector<2x8xf32>
    %c4 = arith.constant 4 : index
    %175 = memref.load %arg1[%c4] : memref<5xf32, #tpu.memory_space<smem>>
    %176 = arith.truncf %174 : vector<2x8xf32> to vector<2x8xbf16>
    %c0_87 = arith.constant 0 : index
    %c0_88 = arith.constant 0 : index
    %177 = vector.load %arg25[%c0_87, %c0_88] : memref<8x192xbf16, #tpu.memory_space<vmem>>, vector<8x192xbf16>
    %cst_89 = arith.constant dense<0.000000e+00> : vector<2x192xf32>
    %178 = tpu.matmul %176, %177, %cst_89 {dimension_numbers = #tpu.dot_dimension_numbers<[1], [0], [0], [1], [0, 0, 1, 1], [], []>} : vector<2x8xbf16>, vector<8x192xbf16>, vector<2x192xf32> -> vector<2x192xf32>
    %c0_90 = arith.constant 0 : index
    %c0_91 = arith.constant 0 : index
    %179 = vector.load %arg26[%c0_90, %c0_91] : memref<1x192xf32, #tpu.memory_space<vmem>>, vector<1x192xf32>
    %180 = vector.broadcast %179 : vector<1x192xf32> to vector<2x192xf32>
    %181 = arith.addf %178, %180 : vector<2x192xf32>
    %cst_92 = arith.constant 0.000000e+00 : f32
    %182 = vector.broadcast %cst_92 : f32 to vector<2x192xf32>
    %183 = arith.cmpf oge, %181, %182 : vector<2x192xf32>
    %184 = vector.broadcast %175 : f32 to vector<2x192xf32>
    %185 = arith.mulf %184, %181 : vector<2x192xf32>
    %186 = arith.select %183, %181, %185 : vector<2x192xi1>, vector<2x192xf32>
    %187 = arith.truncf %186 : vector<2x192xf32> to vector<2x192xbf16>
    %c0_93 = arith.constant 0 : index
    %c0_94 = arith.constant 0 : index
    %188 = vector.load %arg27[%c0_93, %c0_94] : memref<192x256xbf16, #tpu.memory_space<vmem>>, vector<192x256xbf16>
    %cst_95 = arith.constant dense<0.000000e+00> : vector<2x256xf32>
    %189 = tpu.matmul %187, %188, %cst_95 {dimension_numbers = #tpu.dot_dimension_numbers<[1], [0], [0], [1], [0, 0, 1, 1], [], []>} : vector<2x192xbf16>, vector<192x256xbf16>, vector<2x256xf32> -> vector<2x256xf32>
    %c0_96 = arith.constant 0 : index
    %c0_97 = arith.constant 0 : index
    %190 = vector.load %arg28[%c0_96, %c0_97] : memref<1x256xf32, #tpu.memory_space<vmem>>, vector<1x256xf32>
    %191 = vector.broadcast %190 : vector<1x256xf32> to vector<2x256xf32>
    %192 = arith.addf %189, %191 : vector<2x256xf32>
    %193 = math.tanh %192 : vector<2x256xf32>
    %c0_98 = arith.constant 0 : index
    %c0_99 = arith.constant 0 : index
    %194 = vector.load %arg31[%c0_98, %c0_99] : memref<2x256xf32, #tpu.memory_space<vmem>>, vector<2x256xf32>
    tpu.vector_store %arg31[%c0_98, %c0_99], %193 {strides = array<i32>} : memref<2x256xf32, #tpu.memory_space<vmem>>, vector<2x256xf32>,
    return
  }
  func.func @transform_0(%arg0: i32) -> i32 {
    %c0_i32 = arith.constant 0 : i32
    %c0_i32_0 = arith.constant 0 : i32
    return %c0_i32 : i32
  }
  func.func @transform_1(%arg0: i32) -> (i32, i32) {
    %c0_i32 = arith.constant 0 : i32
    %c0_i32_0 = arith.constant 0 : i32
    %c0_i32_1 = arith.constant 0 : i32
    return %c0_i32, %c0_i32_0 : i32, i32
  }
  func.func @transform_2(%arg0: i32) -> (i32, i32) {
    %c0_i32 = arith.constant 0 : i32
    %c0_i32_0 = arith.constant 0 : i32
    %c0_i32_1 = arith.constant 0 : i32
    return %c0_i32, %c0_i32_0 : i32, i32
  }
  func.func @transform_3(%arg0: i32) -> (i32, i32) {
    %c0_i32 = arith.constant 0 : i32
    %c0_i32_0 = arith.constant 0 : i32
    %c0_i32_1 = arith.constant 0 : i32
    return %c0_i32, %c0_i32_0 : i32, i32
  }
  func.func @transform_4(%arg0: i32) -> (i32, i32) {
    %c0_i32 = arith.constant 0 : i32
    %c0_i32_0 = arith.constant 0 : i32
    %c0_i32_1 = arith.constant 0 : i32
    return %c0_i32, %c0_i32_0 : i32, i32
  }
  func.func @transform_5(%arg0: i32) -> (i32, i32) {
    %c0_i32 = arith.constant 0 : i32
    %c0_i32_0 = arith.constant 0 : i32
    %c0_i32_1 = arith.constant 0 : i32
    return %c0_i32, %c0_i32_0 : i32, i32
  }
  func.func @transform_6(%arg0: i32) -> (i32, i32) {
    %c0_i32 = arith.constant 0 : i32
    %c0_i32_0 = arith.constant 0 : i32
    %c0_i32_1 = arith.constant 0 : i32
    return %c0_i32, %c0_i32_0 : i32, i32
  }
  func.func @transform_7(%arg0: i32) -> (i32, i32) {
    %c0_i32 = arith.constant 0 : i32
    %c0_i32_0 = arith.constant 0 : i32
    %c0_i32_1 = arith.constant 0 : i32
    return %c0_i32, %c0_i32_0 : i32, i32
  }
  func.func @transform_8(%arg0: i32) -> (i32, i32) {
    %c0_i32 = arith.constant 0 : i32
    %c0_i32_0 = arith.constant 0 : i32
    %c0_i32_1 = arith.constant 0 : i32
    return %c0_i32, %c0_i32_0 : i32, i32
  }
  func.func @transform_9(%arg0: i32) -> (i32, i32) {
    %c0_i32 = arith.constant 0 : i32
    %c0_i32_0 = arith.constant 0 : i32
    %c0_i32_1 = arith.constant 0 : i32
    return %c0_i32, %c0_i32_0 : i32, i32
  }
  func.func @transform_10(%arg0: i32) -> (i32, i32) {
    %c0_i32 = arith.constant 0 : i32
    %c0_i32_0 = arith.constant 0 : i32
    %c0_i32_1 = arith.constant 0 : i32
    return %c0_i32, %c0_i32_0 : i32, i32
  }
  func.func @transform_11(%arg0: i32) -> (i32, i32) {
    %c0_i32 = arith.constant 0 : i32
    %c0_i32_0 = arith.constant 0 : i32
    %c0_i32_1 = arith.constant 0 : i32
    return %c0_i32, %c0_i32_0 : i32, i32
  }
  func.func @transform_12(%arg0: i32) -> (i32, i32) {
    %c0_i32 = arith.constant 0 : i32
    %c0_i32_0 = arith.constant 0 : i32
    %c0_i32_1 = arith.constant 0 : i32
    return %c0_i32, %c0_i32_0 : i32, i32
  }
  func.func @transform_13(%arg0: i32) -> (i32, i32) {
    %c0_i32 = arith.constant 0 : i32
    %c0_i32_0 = arith.constant 0 : i32
    %c0_i32_1 = arith.constant 0 : i32
    return %c0_i32, %c0_i32_0 : i32, i32
  }
  func.func @transform_14(%arg0: i32) -> (i32, i32) {
    %c0_i32 = arith.constant 0 : i32
    %c0_i32_0 = arith.constant 0 : i32
    %c0_i32_1 = arith.constant 0 : i32
    return %c0_i32, %c0_i32_0 : i32, i32
  }
  func.func @transform_15(%arg0: i32) -> (i32, i32) {
    %c0_i32 = arith.constant 0 : i32
    %c0_i32_0 = arith.constant 0 : i32
    %c0_i32_1 = arith.constant 0 : i32
    return %c0_i32, %c0_i32_0 : i32, i32
  }
  func.func @transform_16(%arg0: i32) -> (i32, i32) {
    %c0_i32 = arith.constant 0 : i32
    %c0_i32_0 = arith.constant 0 : i32
    %c0_i32_1 = arith.constant 0 : i32
    return %c0_i32, %c0_i32_0 : i32, i32
  }
  func.func @transform_17(%arg0: i32) -> (i32, i32) {
    %c0_i32 = arith.constant 0 : i32
    %c0_i32_0 = arith.constant 0 : i32
    %c0_i32_1 = arith.constant 0 : i32
    return %c0_i32, %c0_i32_0 : i32, i32
  }
  func.func @transform_18(%arg0: i32) -> (i32, i32) {
    %c0_i32 = arith.constant 0 : i32
    %c0_i32_0 = arith.constant 0 : i32
    %c0_i32_1 = arith.constant 0 : i32
    return %c0_i32, %c0_i32_0 : i32, i32
  }
  func.func @transform_19(%arg0: i32) -> (i32, i32) {
    %c0_i32 = arith.constant 0 : i32
    %c0_i32_0 = arith.constant 0 : i32
    %c0_i32_1 = arith.constant 0 : i32
    return %c0_i32, %c0_i32_0 : i32, i32
  }
  func.func @transform_20(%arg0: i32) -> (i32, i32) {
    %c0_i32 = arith.constant 0 : i32
    %c0_i32_0 = arith.constant 0 : i32
    %c0_i32_1 = arith.constant 0 : i32
    return %c0_i32, %c0_i32_0 : i32, i32
  }
  func.func @transform_21(%arg0: i32) -> (i32, i32) {
    %c0_i32 = arith.constant 0 : i32
    %c0_i32_0 = arith.constant 0 : i32
    %c0_i32_1 = arith.constant 0 : i32
    return %c0_i32, %c0_i32_0 : i32, i32
  }
  func.func @transform_22(%arg0: i32) -> (i32, i32) {
    %c0_i32 = arith.constant 0 : i32
    %c0_i32_0 = arith.constant 0 : i32
    %c0_i32_1 = arith.constant 0 : i32
    return %c0_i32, %c0_i32_0 : i32, i32
  }
  func.func @transform_23(%arg0: i32) -> (i32, i32) {
    %c0_i32 = arith.constant 0 : i32
    %c0_i32_0 = arith.constant 0 : i32
    %c0_i32_1 = arith.constant 0 : i32
    return %c0_i32, %c0_i32_0 : i32, i32
  }
  func.func @transform_24(%arg0: i32) -> (i32, i32) {
    %c0_i32 = arith.constant 0 : i32
    %c0_i32_0 = arith.constant 0 : i32
    %c0_i32_1 = arith.constant 0 : i32
    return %c0_i32, %c0_i32_0 : i32, i32
  }
  func.func @transform_25(%arg0: i32) -> (i32, i32) {
    %c0_i32 = arith.constant 0 : i32
    %c0_i32_0 = arith.constant 0 : i32
    %c0_i32_1 = arith.constant 0 : i32
    return %c0_i32, %c0_i32_0 : i32, i32
  }
  func.func @transform_26(%arg0: i32) -> (i32, i32) {
    %c0_i32 = arith.constant 0 : i32
    %c0_i32_0 = arith.constant 0 : i32
    %c0_i32_1 = arith.constant 0 : i32
    return %c0_i32, %c0_i32_0 : i32, i32
  }
  func.func @transform_27(%arg0: i32) -> (i32, i32) {
    %c0_i32 = arith.constant 0 : i32
    %c0_i32_0 = arith.constant 0 : i32
    %c0_i32_1 = arith.constant 0 : i32
    return %c0_i32, %c0_i32_0 : i32, i32
  }
  func.func @transform_28(%arg0: i32) -> (i32, i32) {
    %c0_i32 = arith.constant 0 : i32
    %c0_i32_0 = arith.constant 0 : i32
    %c0_i32_1 = arith.constant 0 : i32
    return %c0_i32, %c0_i32_0 : i32, i32
  }
  func.func @transform_29(%arg0: i32) -> (i32, i32) {
    %c0_i32 = arith.constant 0 : i32
    %c0_i32_0 = arith.constant 0 : i32
    %c0_i32_1 = arith.constant 0 : i32
    return %c0_i32, %c0_i32_0 : i32, i32
  }
  func.func @transform_30(%arg0: i32) -> (i32, i32) {
    %c0_i32 = arith.constant 0 : i32
    %c0_i32_0 = arith.constant 0 : i32
    %c0_i32_1 = arith.constant 0 : i32
    return %c0_i32, %c0_i32_0 : i32, i32
  }
}

</mosaic_0001>

<bundles_post_ra>
// kernel: _lambda_.1
= control target key start
LH: loop header
LB: loop body
LE: loop exit
PB: predicated region body
PF: predicated region fallthrough
CT: control target
= control target key end

     0   :  { %s2304_s6 = smov 1   ;;  %s2305_s10 = smov 2   ;;  %s2701_s0 = inlined_call_operand.smem [shape: u32[31], index: -1, kind: input, shape index: {}] }
   0x1   :  { %s2365_s5 = sld [smem:[%s2701_s0]]   ;;  %s2306_s14 = smov 3  }
   0x2   :  { %s2370_s9 = sld [smem:[%s2701_s0 + %s2304_s6]]   ;;  %s2307_s18 = smov 4  }
   0x3   :  { %s2375_s13 = sld [smem:[%s2701_s0 + %s2305_s10]]   ;;  %s2308_s22 = smov 5  }
   0x4   :  { %s2380_s17 = sld [smem:[%s2701_s0 + %s2306_s14]]   ;;  %s2309_s26 = smov 6  }
   0x5   :  { %s2385_s21 = sld [smem:[%s2701_s0 + %s2307_s18]]   ;;  %s2310_s30 = smov 7  }
   0x6   :  { %s2390_s25 = sld [smem:[%s2701_s0 + %s2308_s22]]   ;;  %s2311_s4 = smov 8  }
   0x7   :  { %s2395_s29 = sld [smem:[%s2701_s0 + %s2309_s26]]   ;;  %s2312_s10 = smov 9  }
   0x8   :  { %2705 = sst [smem:[#allocation36_spill]] %s2370_s9  ;;  %s2313_s15 = smov 10  }
   0x9   :  { %s2400_s3 = sld [smem:[%s2701_s0 + %s2310_s30]]   ;;  %s2314_s20 = smov 11  }
   0xa   :  { %s2405_s8 = sld [smem:[%s2701_s0 + %s2311_s4]]   ;;  %s2315_s26 = smov 12  }
   0xb   :  { %2706 = sst [smem:[#allocation37_spill]] %s2385_s21  ;;  %s2316_s1 = smov 13  }
   0xc   :  { %2707 = sst [smem:[#allocation38_spill]] %s2390_s25  ;;  %s2317_s7 = smov 14  }
   0xd   :  { %2708 = sst [smem:[#allocation39_spill]] %s2395_s29  ;;  %s2319_s22 = smov 16  }
   0xe   :  { %s2410_s14 = sld [smem:[%s2701_s0 + %s2312_s10]]   ;;  %s2320_s28 = smov 17  }
   0xf   :  { %2709 = sst [smem:[#allocation40_spill]] %s2400_s3 }
  0x10   :  { %2710 = sst [smem:[#allocation41_spill]] %s2405_s8 }
  0x11   :  { %s2415_s19 = sld [smem:[%s2701_s0 + %s2313_s15]]   ;;  %s2318_s15 = smov 15  }
  0x12   :  { %s2420_s24 = sld [smem:[%s2701_s0 + %s2314_s20]]  }
  0x13   :  { %s2425_s30 = sld [smem:[%s2701_s0 + %s2315_s26]]  }
  0x14   :  { %s2430_s6 = sld [smem:[%s2701_s0 + %s2316_s1]]  }
  0x15   :  { %s2435_s12 = sld [smem:[%s2701_s0 + %s2317_s7]]   ;;  %s2321_s7 = smov 18  }
  0x16   :  { %s2440_s20 = sld [smem:[%s2701_s0 + %s2318_s15]]   ;;  %s2322_s15 = smov 19  }
  0x17   :  { %2711 = sst [smem:[#allocation42_spill]] %s2415_s19 }
  0x18   :  { %s2445_s27 = sld [smem:[%s2701_s0 + %s2319_s22]]   ;;  %s2323_s22 = smov 20  }
  0x19   :  { %s2450_s4 = sld [smem:[%s2701_s0 + %s2320_s28]]   ;;  %s2324_s28 = smov 21  }
  0x1a   :  { %s2455_s21 = sld [smem:[%s2701_s0 + %s2321_s7]]   ;;  %s2325_s7 = smov 22  }
  0x1b   :  { %s2470_s19 = sld [smem:[%s2701_s0 + %s2324_s28]]   ;;  %s2328_s28 = smov 25  }
  0x1c   :  { %2712 = sst [smem:[#allocation43_spill]] %s2440_s20 }
  0x1d   :  { %s2460_s20 = sld [smem:[%s2701_s0 + %s2322_s15]]   ;;  %s2326_s15 = smov 23  }
  0x1e   :  { %2713 = sst [smem:[#allocation44_spill]] %s2445_s27 }
  0x1f   :  { %s2465_s27 = sld [smem:[%s2701_s0 + %s2323_s22]]   ;;  %s2327_s22 = smov 24  }
  0x20   :  { %s2475_s8 = sld [smem:[%s2701_s0 + %s2325_s7]]   ;;  %s2329_s7 = smov 26  }
  0x21   :  { %2714 = sst [smem:[#allocation45_spill]] %s2470_s19 }
  0x22   :  { %s2480_s29 = sld [smem:[%s2701_s0 + %s2326_s15]]   ;;  %s2330_s15 = smov 27  }
  0x23   :  { %s2485_s3 = sld [smem:[%s2701_s0 + %s2327_s22]]   ;;  %s2331_s22 = smov 28  }
  0x24   :  { %s2490_s19 = sld [smem:[%s2701_s0 + %s2328_s28]]   ;;  %s2332_s28 = smov 29  }
  0x25   :  { %s2500_s9 = sld [smem:[%s2701_s0 + %s2330_s15]]  }
  0x26   :  { %2715 = sst [smem:[#allocation46_spill]] %s2475_s8 }
  0x27   :  { %s2495_s8 = sld [smem:[%s2701_s0 + %s2329_s7]]   ;;  %s2333_s7 = smov 30  }
  0x28   :  { %s2505_s25 = sld [smem:[%s2701_s0 + %s2331_s22]]  }
  0x29   :  { %2716 = sst [smem:[#allocation47_spill]] %s2485_s3 }
  0x2a   :  { %s2510_s3 = sld [smem:[%s2701_s0 + %s2332_s28]]  }
  0x2d   :  { %2717 = sst [smem:[#allocation48_spill]] %s2495_s8 }
  0x2e   :  { %s2515_s8 = sld [smem:[%s2701_s0 + %s2333_s7]]  }
  0x2f   :  { %67 = vsyncpa [#allocation4], 0 }
  0x30   :  { %68 = vsyncpa [#allocation3], 0 }
  0x31   :  { %69 = vsyncpa [#allocation7], 0 }
  0x32   :  { %70 = vsyncpa [#allocation10], 0 }
  0x33   :  { %71 = vsyncpa [#allocation13], 0 }
  0x34   :  { %72 = vsyncpa [#allocation16], 0 }
  0x35   :  { %73 = vsyncpa [#allocation19], 0 }
  0x36   :  { %74 = vsyncpa [#allocation22], 0  ;;  %s103_s15 = sshll.u32 %s2380_s17, 4  ;;  %s104_s15 = int_to_ptr.hbm [resolvable:$true] %s103_s15 }
  0x37   :  { %75 = vsyncpa [#allocation25], 0  ;;  %s2334_s16 = smov [#allocation6]   ;;  %s138_s0 = sshll.u32 %s2420_s24, 4  ;;  %s139_s0 = int_to_ptr.hbm [resolvable:$true] %s138_s0 }
  0x38   :  { %s105_s18 = sshll.u32 %s2334_s16, 4  ;;  %s1914_s22 = sshra.s32 %s104_s15, 4  ;;  %s106_s18 = int_to_ptr.vmem [resolvable:$true] %s105_s18  ;;  %s1915_s22 = int_to_ptr.hbm [resolvable:$true] %s1914_s22 }
  0x39   :  { %s1916_s23 = scalar_lea.hbm %s1915_s22, 2  ;;  %s1918_s26 = scalar_lea.hbm %s2380_s17, 2 }
  0x3a   :  { %p1917_p0 = scmp.ne.s32.totalorder %s1915_s22, %s1916_s23  ;;  %p1919_p1 = scmp.lt.s32.totalorder %s1915_s22, %s2380_s17 }
  0x3b   :  { %p1920_p2 = scmp.lt.s32.totalorder %s1918_s26, %s1916_s23 }
  0x3d   :  { %p1921_p3 = por %p1920_p2, %p1919_p1 }
  0x3f   :  { %p1922_p4 = pnand %p1921_p3, %p1917_p0 }
  0x41   :  { %1925 = shalt.err (!%p1922_p4)
}
  0x42   :  { %108 = dma.hbm_to_vmem [thread:$0]  %s104_s15, 32, %s106_s18, [#allocation7]  }
  0x43   :  { %s2335_s28 = smov [#allocation9]   ;;  %s1938_s2 = sshra.s32 %s139_s0, 4  ;;  %s1939_s2 = int_to_ptr.hbm [resolvable:$true] %s1938_s2 }
  0x44   :  { %s140_s1 = sshll.u32 %s2335_s28, 4  ;;  %s1940_s7 = scalar_lea.hbm %s1939_s2, 32  ;;  %s141_s1 = int_to_ptr.vmem [resolvable:$true] %s140_s1 }
  0x45   :  { %p1941_p5 = scmp.ne.s32.totalorder %s1939_s2, %s1940_s7  ;;  %s1942_s10 = scalar_lea.hbm %s2420_s24, 32 }
  0x46   :  { %p1943_p6 = scmp.lt.s32.totalorder %s1939_s2, %s2420_s24  ;;  %p1944_p7 = scmp.lt.s32.totalorder %s1942_s10, %s1940_s7 }
  0x48   :  { %p1945_p8 = por %p1944_p7, %p1943_p6 }
  0x4a   :  { %p1946_p9 = pnand %p1945_p8, %p1941_p5 }
  0x4c   :  { %1949 = shalt.err (!%p1946_p9)
}
  0x4d   :  { %s2336_s17 = smov 64   ;;  %s2337_s11 = smov 4  }
  0x4e   :  { %146 = dma.hbm_to_vmem [thread:$0]  %s139_s0, 512, %s141_s1, [#allocation10], %s2336_s17, %s2336_s17, %s2337_s11  }
  0x4f   :  { %s163_s15 = sshll.u32 %s2430_s6, 4  ;;  %s2338_s16 = smov [#allocation12]   ;;  %s164_s15 = int_to_ptr.hbm [resolvable:$true] %s163_s15 }
  0x50   :  { %s165_s18 = sshll.u32 %s2338_s16, 4  ;;  %s189_s22 = sshll.u32 %s2450_s4, 4  ;;  %s166_s18 = int_to_ptr.vmem [resolvable:$true] %s165_s18  ;;  %s190_s22 = int_to_ptr.hbm [resolvable:$true] %s189_s22 }
  0x51   :  { %s1962_s23 = sshra.s32 %s164_s15, 4  ;;  %s1966_s26 = scalar_lea.hbm %s2430_s6, 2  ;;  %s1963_s23 = int_to_ptr.hbm [resolvable:$true] %s1962_s23 }
  0x52   :  { %s1964_s24 = scalar_lea.hbm %s1963_s23, 2  ;;  %p1967_p11 = scmp.lt.s32.totalorder %s1963_s23, %s2430_s6 }
  0x53   :  { %p1965_p10 = scmp.ne.s32.totalorder %s1963_s23, %s1964_s24  ;;  %p1968_p12 = scmp.lt.s32.totalorder %s1966_s26, %s1964_s24 }
  0x55   :  { %p1969_p13 = por %p1968_p12, %p1967_p11 }
  0x57   :  { %p1970_p0 = pnand %p1969_p13, %p1965_p10 }
  0x59   :  { %1973 = shalt.err (!%p1970_p0)
}
  0x5a   :  { %168 = dma.hbm_to_vmem [thread:$0]  %s164_s15, 32, %s166_s18, [#allocation13]  }
  0x5b   :  { %s2339_s0 = smov [#allocation15]   ;;  %s213_s1 = sshll.u32 %s2460_s20, 4  ;;  %s214_s1 = int_to_ptr.hbm [resolvable:$true] %s213_s1 }
  0x5c   :  { %s191_s28 = sshll.u32 %s2339_s0, 4  ;;  %s1986_s2 = sshra.s32 %s190_s22, 4  ;;  %s192_s28 = int_to_ptr.vmem [resolvable:$true] %s191_s28  ;;  %s1987_s2 = int_to_ptr.hbm [resolvable:$true] %s1986_s2 }
  0x5d   :  { %s1988_s7 = scalar_lea.hbm %s1987_s2, 1  ;;  %s1990_s10 = scalar_lea.hbm %s2450_s4, 1 }
  0x5e   :  { %p1989_p1 = scmp.ne.s32.totalorder %s1987_s2, %s1988_s7  ;;  %p1991_p2 = scmp.lt.s32.totalorder %s1987_s2, %s2450_s4 }
  0x5f   :  { %p1992_p3 = scmp.lt.s32.totalorder %s1990_s10, %s1988_s7 }
  0x61   :  { %p1993_p4 = por %p1992_p3, %p1991_p2 }
  0x63   :  { %p1994_p5 = pnand %p1993_p4, %p1989_p1 }
  0x65   :  { %1997 = shalt.err (!%p1994_p5)
}
  0x66   :  { %194 = dma.hbm_to_vmem [thread:$0]  %s190_s22, 16, %s192_s28, [#allocation16]  }
  0x67   :  { %s241_s6 = sshll.u32 %s2480_s29, 4  ;;  %s2340_s17 = smov [#allocation18]   ;;  %s242_s6 = int_to_ptr.hbm [resolvable:$true] %s241_s6 }
  0x68   :  { %s215_s11 = sshll.u32 %s2340_s17, 4  ;;  %s2010_s15 = sshra.s32 %s214_s1, 4  ;;  %s216_s11 = int_to_ptr.vmem [resolvable:$true] %s215_s11  ;;  %s2011_s15 = int_to_ptr.hbm [resolvable:$true] %s2010_s15 }
  0x69   :  { %s2012_s16 = scalar_lea.hbm %s2011_s15, 2  ;;  %s2014_s18 = scalar_lea.hbm %s2460_s20, 2 }
  0x6a   :  { %p2013_p6 = scmp.ne.s32.totalorder %s2011_s15, %s2012_s16  ;;  %p2015_p7 = scmp.lt.s32.totalorder %s2011_s15, %s2460_s20 }
  0x6b   :  { %p2016_p8 = scmp.lt.s32.totalorder %s2014_s18, %s2012_s16 }
  0x6d   :  { %p2017_p9 = por %p2016_p8, %p2015_p7 }
  0x6f   :  { %p2018_p10 = pnand %p2017_p9, %p2013_p6 }
  0x71   :  { %2021 = shalt.err (!%p2018_p10)
}
  0x72   :  { %218 = dma.hbm_to_vmem [thread:$0]  %s214_s1, 32, %s216_s11, [#allocation19]  }
  0x73   :  { %s2341_s4 = smov [#allocation21]   ;;  %s263_s23 = sshll.u32 %s2490_s19, 4  ;;  %s264_s23 = int_to_ptr.hbm [resolvable:$true] %s263_s23 }
  0x74   :  { %s243_s22 = sshll.u32 %s2341_s4, 4  ;;  %s2034_s24 = sshra.s32 %s242_s6, 4  ;;  %s244_s22 = int_to_ptr.vmem [resolvable:$true] %s243_s22  ;;  %s2035_s24 = int_to_ptr.hbm [resolvable:$true] %s2034_s24 }
  0x75   :  { %s2036_s26 = scalar_lea.hbm %s2035_s24, 1  ;;  %s2038_s0 = scalar_lea.hbm %s2480_s29, 1 }
  0x76   :  { %p2037_p11 = scmp.ne.s32.totalorder %s2035_s24, %s2036_s26  ;;  %p2039_p12 = scmp.lt.s32.totalorder %s2035_s24, %s2480_s29 }
  0x77   :  { %p2040_p13 = scmp.lt.s32.totalorder %s2038_s0, %s2036_s26 }
  0x79   :  { %p2041_p0 = por %p2040_p13, %p2039_p12 }
  0x7b   :  { %p2042_p1 = pnand %p2041_p0, %p2037_p11 }
  0x7d   :  { %2045 = shalt.err (!%p2042_p1)
}
  0x7e   :  { %246 = dma.hbm_to_vmem [thread:$0]  %s242_s6, 16, %s244_s22, [#allocation22]  }
  0x7f   :  { %s81_s20 = sshll.u32 %s2365_s5, 4  ;;  %s2342_s28 = smov [#allocation24]   ;;  %s82_s20 = int_to_ptr.vmem [resolvable:$true] %s81_s20 }
  0x80   :  { %s265_s1 = sshll.u32 %s2342_s28, 4  ;;  %s2058_s2 = sshra.s32 %s264_s23, 4  ;;  %s266_s1 = int_to_ptr.vmem [resolvable:$true] %s265_s1  ;;  %s2059_s2 = int_to_ptr.hbm [resolvable:$true] %s2058_s2 }
  0x81   :  { %s2060_s7 = scalar_lea.hbm %s2059_s2, 2  ;;  %s2062_s10 = scalar_lea.hbm %s2490_s19, 2 }
  0x82   :  { %p2061_p2 = scmp.ne.s32.totalorder %s2059_s2, %s2060_s7  ;;  %p2063_p3 = scmp.lt.s32.totalorder %s2059_s2, %s2490_s19 }
  0x83   :  { %p2064_p4 = scmp.lt.s32.totalorder %s2062_s10, %s2060_s7 }
  0x85   :  { %p2065_p5 = por %p2064_p4, %p2063_p3 }
  0x87   :  { %p2066_p6 = pnand %p2065_p5, %p2061_p2 }
  0x89   :  { %2069 = shalt.err (!%p2066_p6)
}
  0x8a   :  { %268 = dma.hbm_to_vmem [thread:$0]  %s264_s23, 32, %s266_s1, [#allocation25]  }
  0x8b   :  { %s2082_s29 = sshra.s32 %s82_s20, 4  ;;  %s2086_s17 = scalar_lea.vmem %s2365_s5, 1  ;;  %s2083_s29 = int_to_ptr.vmem [resolvable:$true] %s2082_s29 }
  0x8c   :  { %s2084_s6 = scalar_lea.vmem %s2083_s29, 1  ;;  %p2087_p8 = scmp.lt.s32.totalorder %s2083_s29, %s2365_s5 }
  0x8d   :  { %p2085_p7 = scmp.ne.s32.totalorder %s2083_s29, %s2084_s6  ;;  %p2088_p9 = scmp.lt.s32.totalorder %s2086_s17, %s2084_s6 }
  0x8f   :  { %p2089_p10 = por %p2088_p9, %p2087_p8 }
  0x91   :  { %p2090_p11 = pnand %p2089_p10, %p2085_p7 }
  0x93   :  { %2093 = shalt.err (!%p2090_p11)
}
  0x94   :  { %s2343_s11 = smov [#allocation2]   ;;  %s92_s19 = sshll.u32 %s2375_s13, 4  ;;  %s93_s19 = int_to_ptr.hbm [resolvable:$true] %s92_s19 }
  0x95   :  { %84 = dma.vmem_to_smem %s82_s20, 16, %s2343_s11, [#allocation4]  }
  0x96   :  { %s2344_s15 = smov [#allocation5]   ;;  %s123_s18 = sshll.u32 %s2410_s14, 4  ;;  %s124_s18 = int_to_ptr.hbm [resolvable:$true] %s123_s18 }
  0x97   :  { %s94_s16 = sshll.u32 %s2344_s15, 4  ;;  %s2094_s4 = sshra.s32 %s93_s19, 4  ;;  %s95_s16 = int_to_ptr.vmem [resolvable:$true] %s94_s16  ;;  %s2095_s4 = int_to_ptr.hbm [resolvable:$true] %s2094_s4 }
  0x98   :  { %s2096_s22 = scalar_lea.hbm %s2095_s4, 2  ;;  %s2098_s5 = scalar_lea.hbm %s2375_s13, 2 }
  0x99   :  { %p2097_p12 = scmp.ne.s32.totalorder %s2095_s4, %s2096_s22  ;;  %p2099_p13 = scmp.lt.s32.totalorder %s2095_s4, %s2375_s13 }
  0x9a   :  { %p2100_p0 = scmp.lt.s32.totalorder %s2098_s5, %s2096_s22 }
  0x9c   :  { %p2101_p1 = por %p2100_p0, %p2099_p13 }
  0x9e   :  { %p2102_p2 = pnand %p2101_p1, %p2097_p12 }
  0xa0   :  { %2105 = shalt.err (!%p2102_p2)
}
  0xa1   :  { %97 = dma.hbm_to_vmem [thread:$0]  %s93_s19, 32, %s95_s16, [#allocation3]  }
  0xa2   :  { %s2345_s23 = smov [#allocation8]   ;;  %s2118_s26 = sshra.s32 %s124_s18, 4  ;;  %s2119_s26 = int_to_ptr.hbm [resolvable:$true] %s2118_s26 }
  0xa3   :  { %s125_s24 = sshll.u32 %s2345_s23, 4  ;;  %s2120_s0 = scalar_lea.hbm %s2119_s26, 64  ;;  %s126_s24 = int_to_ptr.vmem [resolvable:$true] %s125_s24 }
  0xa4   :  { %p2121_p3 = scmp.ne.s32.totalorder %s2119_s26, %s2120_s0  ;;  %s2122_s20 = scalar_lea.hbm %s2410_s14, 64 }
  0xa5   :  { %p2123_p4 = scmp.lt.s32.totalorder %s2119_s26, %s2410_s14  ;;  %p2124_p5 = scmp.lt.s32.totalorder %s2122_s20, %s2120_s0 }
  0xa7   :  { %p2125_p6 = por %p2124_p5, %p2123_p4 }
  0xa9   :  { %p2126_p7 = pnand %p2125_p6, %p2121_p3 }
  0xab   :  { %2129 = shalt.err (!%p2126_p7)
}
  0xac   :  { %s2346_s13 = smov 128   ;;  %s2347_s28 = smov 8  }
  0xad   :  { %131 = dma.hbm_to_vmem [thread:$0]  %s124_s18, 1024, %s126_s24, [#allocation7], %s2346_s13, %s2346_s13, %s2347_s28  }
  0xae   :  { %s152_s1 = sshll.u32 %s2425_s30, 4  ;;  %s2348_s2 = smov [#allocation11]   ;;  %s153_s1 = int_to_ptr.hbm [resolvable:$true] %s152_s1 }
  0xaf   :  { %s154_s7 = sshll.u32 %s2348_s2, 4  ;;  %s174_s14 = sshll.u32 %s2435_s12, 4  ;;  %s155_s7 = int_to_ptr.vmem [resolvable:$true] %s154_s7  ;;  %s175_s14 = int_to_ptr.hbm [resolvable:$true] %s174_s14 }
  0xb0   :  { %s2142_s10 = sshra.s32 %s153_s1, 4  ;;  %s2146_s6 = scalar_lea.hbm %s2425_s30, 1  ;;  %s2143_s10 = int_to_ptr.hbm [resolvable:$true] %s2142_s10 }
  0xb1   :  { %s2144_s29 = scalar_lea.hbm %s2143_s10, 1  ;;  %p2147_p9 = scmp.lt.s32.totalorder %s2143_s10, %s2425_s30 }
  0xb2   :  { %p2145_p8 = scmp.ne.s32.totalorder %s2143_s10, %s2144_s29  ;;  %p2148_p10 = scmp.lt.s32.totalorder %s2146_s6, %s2144_s29 }
  0xb4   :  { %p2149_p11 = por %p2148_p10, %p2147_p9 }
  0xb6   :  { %p2150_p12 = pnand %p2149_p11, %p2145_p8 }
  0xb8   :  { %2153 = shalt.err (!%p2150_p12)
}
  0xb9   :  { %157 = dma.hbm_to_vmem [thread:$0]  %s153_s1, 16, %s155_s7, [#allocation10]  }
  0xba   :  { %s2349_s17 = smov [#allocation14]   ;;  %s199_s19 = sshll.u32 %s2455_s21, 4  ;;  %s2555_s19 = int_to_ptr.hbm [resolvable:$true] %s199_s19 }
  0xbb   :  { %s176_s11 = sshll.u32 %s2349_s17, 4  ;;  %s2166_s15 = sshra.s32 %s175_s14, 4  ;;  %s177_s11 = int_to_ptr.vmem [resolvable:$true] %s176_s11  ;;  %s2167_s15 = int_to_ptr.hbm [resolvable:$true] %s2166_s15 }
  0xbc   :  { %s2168_s16 = scalar_lea.hbm %s2167_s15, 2  ;;  %s2170_s30 = scalar_lea.hbm %s2435_s12, 2 }
  0xbd   :  { %p2169_p13 = scmp.ne.s32.totalorder %s2167_s15, %s2168_s16  ;;  %p2171_p0 = scmp.lt.s32.totalorder %s2167_s15, %s2435_s12 }
  0xbe   :  { %p2172_p1 = scmp.lt.s32.totalorder %s2170_s30, %s2168_s16 }
  0xc0   :  { %p2173_p2 = por %p2172_p1, %p2171_p0 }
  0xc2   :  { %p2174_p3 = pnand %p2173_p2, %p2169_p13 }
  0xc4   :  { %2177 = shalt.err (!%p2174_p3)
}
  0xc5   :  { %179 = dma.hbm_to_vmem [thread:$0]  %s175_s14, 32, %s177_s11, [#allocation13]  }
  0xc6   :  { %s223_s18 = sshll.u32 %s2465_s27, 4  ;;  %s2350_s4 = smov [#allocation17]   ;;  %s2560_s18 = int_to_ptr.hbm [resolvable:$true] %s223_s18 }
  0xc7   :  { %s201_s22 = sshll.u32 %s2350_s4, 4  ;;  %s2190_s5 = sshra.s32 %s2555_s19, 4  ;;  %s202_s22 = int_to_ptr.vmem [resolvable:$true] %s201_s22  ;;  %s2191_s5 = int_to_ptr.hbm [resolvable:$true] %s2190_s5 }
  0xc8   :  { %s2192_s23 = scalar_lea.hbm %s2191_s5, 64  ;;  %s2194_s12 = scalar_lea.hbm %s2455_s21, 64 }
  0xc9   :  { %p2193_p4 = scmp.ne.s32.totalorder %s2191_s5, %s2192_s23  ;;  %p2195_p5 = scmp.lt.s32.totalorder %s2191_s5, %s2455_s21 }
  0xca   :  { %p2196_p6 = scmp.lt.s32.totalorder %s2194_s12, %s2192_s23 }
  0xcc   :  { %p2197_p7 = por %p2196_p6, %p2195_p5 }
  0xce   :  { %p2198_p8 = pnand %p2197_p7, %p2193_p4 }
  0xd0   :  { %2201 = shalt.err (!%p2198_p8)
}
  0xd1   :  { %s2718_s24 = sld [smem:[#allocation47_spill]]  ;;  %s2351_s26 = smov [#allocation20]  }
  0xd2   :  { %207 = dma.hbm_to_vmem [thread:$0]  %s2555_s19, 1024, %s202_s22, [#allocation16], %s2346_s13, %s2346_s13, %s2347_s28  }
  0xd3   :  { %s225_s0 = sshll.u32 %s2351_s26, 4  ;;  %s2214_s1 = sshra.s32 %s2560_s18, 4  ;;  %s226_s0 = int_to_ptr.vmem [resolvable:$true] %s225_s0  ;;  %s2215_s1 = int_to_ptr.hbm [resolvable:$true] %s2214_s1 }
  0xd4   :  { %s2216_s21 = scalar_lea.hbm %s2215_s1, 192  ;;  %s2218_s2 = scalar_lea.hbm %s2465_s27, 192 }
  0xd5   :  { %p2217_p9 = scmp.ne.s32.totalorder %s2215_s1, %s2216_s21  ;;  %p2219_p10 = scmp.lt.s32.totalorder %s2215_s1, %s2465_s27 }
  0xd6   :  { %p2220_p11 = scmp.lt.s32.totalorder %s2218_s2, %s2216_s21 }
  0xd7   :  { %s252_s20 = sshll.u32 %s2718_s24, 4  ;;  %s253_s20 = int_to_ptr.hbm [resolvable:$true] %s252_s20 }
  0xd8   :  { %p2221_p12 = por %p2220_p11, %p2219_p10 }
  0xda   :  { %p2222_p13 = pnand %p2221_p12, %p2217_p9 }
  0xdc   :  { %2225 = shalt.err (!%p2222_p13)
}
  0xdd   :  { %s2719_s7 = sld [smem:[#allocation48_spill]]  ;;  %s2352_s10 = smov [#allocation23]  }
  0xde   :  { %231 = dma.hbm_to_vmem [thread:$0]  %s2560_s18, 3072, %s226_s0, [#allocation19], %s2346_s13, %s2346_s13, %s2347_s28  }
  0xdf   :  { %s254_s29 = sshll.u32 %s2352_s10, 4  ;;  %s2238_s6 = sshra.s32 %s253_s20, 4  ;;  %s255_s29 = int_to_ptr.vmem [resolvable:$true] %s254_s29  ;;  %s2239_s6 = int_to_ptr.hbm [resolvable:$true] %s2238_s6 }
  0xe0   :  { %s2240_s27 = scalar_lea.hbm %s2239_s6, 8  ;;  %s2242_s17 = scalar_lea.hbm %s2718_s24, 8 }
  0xe1   :  { %p2241_p0 = scmp.ne.s32.totalorder %s2239_s6, %s2240_s27  ;;  %p2243_p1 = scmp.lt.s32.totalorder %s2239_s6, %s2718_s24 }
  0xe2   :  { %p2244_p2 = scmp.lt.s32.totalorder %s2242_s17, %s2240_s27 }
  0xe3   :  { %s273_s14 = sshll.u32 %s2719_s7, 4  ;;  %s2578_s14 = int_to_ptr.hbm [resolvable:$true] %s273_s14 }
  0xe4   :  { %p2245_p3 = por %p2244_p2, %p2243_p1 }
  0xe6   :  { %p2246_p4 = pnand %p2245_p3, %p2241_p0 }
  0xe8   :  { %2249 = shalt.err (!%p2246_p4)
}
  0xe9   :  { %257 = dma.hbm_to_vmem [thread:$0]  %s253_s20, 128, %s255_s29, [#allocation22]  }
  0xea   :  { %s2353_s11 = smov [#allocation26]   ;;  %s2262_s15 = sshra.s32 %s2578_s14, 4  ;;  %s2263_s15 = int_to_ptr.hbm [resolvable:$true] %s2262_s15 }
  0xeb   :  { %s275_s19 = sshll.u32 %s2353_s11, 4  ;;  %s2264_s16 = scalar_lea.hbm %s2263_s15, 192  ;;  %s276_s19 = int_to_ptr.vmem [resolvable:$true] %s275_s19 }
  0xec   :  { %p2265_p5 = scmp.ne.s32.totalorder %s2263_s15, %s2264_s16  ;;  %s2266_s30 = scalar_lea.hbm %s2719_s7, 192 }
  0xed   :  { %p2267_p6 = scmp.lt.s32.totalorder %s2263_s15, %s2719_s7  ;;  %p2268_p7 = scmp.lt.s32.totalorder %s2266_s30, %s2264_s16 }
  0xef   :  { %p2269_p8 = por %p2268_p7, %p2267_p6 }
  0xf1   :  { %p2270_p9 = pnand %p2269_p8, %p2265_p5 }
  0xf3   :  { %2273 = shalt.err (!%p2270_p9)
}
  0xf4   :  { %281 = dma.hbm_to_vmem [thread:$0]  %s2578_s14, 3072, %s276_s19, [#allocation25], %s2346_s13, %s2346_s13, %s2347_s28  }
  0xf5   :  { %2286 = dma.done.wait [#allocation4], 16  }
  0xf6   :  { %2287 = vsyncadd [#allocation4], 4294967280 }
  0xf7   :  { %2288 = dma.done.wait [#allocation3], 32  }
  0xf8   :  { %2289 = vsyncadd [#allocation3], 4294967264 }
  0xf9   :  { %2290 = dma.done.wait [#allocation7], 1056  }
  0xfa   :  { %2291 = vsyncadd [#allocation7], 4294966240 }
  0xfb   :  { %2292 = dma.done.wait [#allocation10], 528  }
  0xfc   :  { %2293 = vsyncadd [#allocation10], 4294966768 }
  0xfd   :  { %2294 = dma.done.wait [#allocation13], 64  }
  0xfe   :  { %2295 = vsyncadd [#allocation13], 4294967232 }
  0xff   :  { %2296 = dma.done.wait [#allocation16], 1040  }
 0x100   :  { %2297 = vsyncadd [#allocation16], 4294966256 }
 0x101   :  { %2298 = dma.done.wait [#allocation19], 3104  }
 0x102   :  { %2299 = vsyncadd [#allocation19], 4294964192 }
 0x103   :  { %2300 = dma.done.wait [#allocation22], 144  }
 0x104   :  { %2301 = vsyncadd [#allocation22], 4294967152 }
 0x105   :  { %2302 = dma.done.wait [#allocation25], 3104  }
 0x106   :  { %2303 = vsyncadd [#allocation25], 4294964192 }
 0x107   :  { %348 = sfence }
 0x108   :  { %s2720_s13 = sld [smem:[#allocation38_spill]]  ;;  %vm366_vm0 = vcmask 130048   ;;  %v441_v12 = vld [vmem:[#allocation8 + $0x38] sm:$0xff]  ;;  %v440_v13 = vld [vmem:[#allocation8 + $0x30] sm:$0xff]  ;;  %v439_v14 = vld [vmem:[#allocation8 + $0x28] sm:$0xff]  ;;  %vm416_vm2 = vcmask 517120  }
 0x109   :  { %s2721_s28 = sld [smem:[#allocation36_spill]]  ;;  %454 = vmatpush.msra.mxu2 %v441_v12  ;;  %v438_v15 = vld [vmem:[#allocation8 + $0x20] sm:$0xff]  ;;  %v437_v16 = vld [vmem:[#allocation8 + $0x18] sm:$0xff]  ;;  %v436_v17 = vld [vmem:[#allocation8 + $0x10] sm:$0xff]  ;;  %vm432_vm3 = vcmask 1040384   ;;  %vm442_vm4 = vcmask 523264  }
 0x10a   :  { %s2722_s18 = sld [smem:[#allocation40_spill]]  ;;  %v435_v18 = vld [vmem:[#allocation8 + $0x8] sm:$0xff]  ;;  %v434_v19 = vld [vmem:[#allocation8] sm:$0xff]  ;;  %vm472_vm5 = vcmask 1043456   ;;  %vm468_vm6 = vcmask 31744   ;;  %v1777_v43 = vld [vmem:[#allocation9 + $0x18] sm:$0xff] }
 0x10b   :  { %s2723_s4 = sld [smem:[#allocation39_spill]]  ;;  %455 = vmatpush.msra.mxu2 %v440_v13  ;;  %v1776_v44 = vld [vmem:[#allocation9 + $0x10] sm:$0xff]  ;;  %v1775_v45 = vld [vmem:[#allocation9 + $0x8] sm:$0xff]  ;;  %v1774_v48 = vld [vmem:[#allocation9] sm:$0xff]  ;;  %s2354_s24 = smov 120  }
 0x10c   :  { %s351_s22 = sld [smem:[#allocation2]]  ;;  %s2355_s20 = smov 24  }
 0x10d   :  { %s2724_s5 = sld [smem:[#allocation41_spill]]  ;;  %456 = vmatpush.msra.mxu2 %v439_v14  ;;  %s2356_s1 = smov 16  }
 0x10e   :  { %v1772_v0 = vld [vmem:[%s2720_s13] sm:$0xff]  ;;  %s2725_s23 = sld [smem:[#allocation42_spill]] }
 0x10f   :  { %v350_v1 = vld [vmem:[%s2721_s28] sm:$0x3]  ;;  %377 = vmatpush.bf16.msra.mxu0 %v1772_v0  ;;  %457 = vmatpush.msra.mxu2 %v438_v15  ;;  %s1549_s12 = sld [smem:[#allocation2 + $0x1]] }
 0x110   :  { %v353_v2 = vpack.c.bf16 %v350_v1, %v350_v1  ;;  %v1773_v3 = vld [vmem:[%s2722_s18] sm:$0xff]  ;;  %s2726_s26 = sld [smem:[#allocation44_spill]] }
 0x111   :  { %410 = vmatpush.bf16.msra.mxu1 %v1773_v3  ;;  %v1875_v4 = vld [vmem:[%s2723_s4] ss:$0 sm:$0xff]  ;;  %458 = vmatpush.msra.mxu2 %v437_v16  ;;  %s2727_s0 = sld [smem:[#allocation37_spill]] }
 0x112   :  { %1554 = vmatmul.msk.bf16.vlgmr.msra.gmra.mxu0 %vm366_vm0, %v353_v2  ;;  %v384_v6 = vstv %s351_s22  ;;  %s2728_s21 = sld [smem:[#allocation45_spill]] }
 0x113   :  { %459 = vmatpush.msra.mxu2 %v436_v17  ;;  %v1876_v20 = vld [vmem:[%s2724_s5] ss:$0 sm:$0xff]  ;;  %s2729_s2 = sld [smem:[#allocation46_spill]] }
 0x114   :  { %v467_v40 = vld [vmem:[%s2725_s23] sm:$0xf]  ;;  %s2663_s7 = sld [smem:[#allocation2 + $0x3]] }
 0x115   :  { %460 = vmatpush.msra.mxu2 %v435_v18  ;;  %1561 = vmatpush.msk.msra.mxu3 %vm472_vm5, %v467_v40  ;;  %v518_v63 = vstv %s1549_s12  ;;  %s2730_s14 = sld [smem:[#allocation43_spill]] }
 0x116   :  { %565 = vmatpush.bf16.msrb.mxu1 %v1777_v43 }
 0x117   :  { %461 = vmatpush.msra.mxu2 %v434_v19 }
 0x11a   :  { %566 = vmatpush.bf16.msrb.mxu1 %v1776_v44 }
 0x11e   :  { %567 = vmatpush.bf16.msrb.mxu1 %v1775_v45 }
 0x122   :  { %568 = vmatpush.bf16.msrb.mxu1 %v1774_v48 }
 0x18f   :  { %v379_v5 = vpop.f32.mrf.mxu0 }
 0x190   :  { %v380_v7 = vadd.f32 %v1875_v4, %v379_v5  ;;  %v1877_v4 = vld [vmem:[#allocation11] ss:$0 sm:$0xff] }
 0x192   :  { %vm383_vm1 = vcmp.ge.f32.partialorder %v380_v7, 0.0  ;;  %v385_v8 = vmul.f32 %v384_v6, %v380_v7 }
 0x194   :  { %v386_v9 = vsel %vm383_vm1, %v380_v7, %v385_v8 }
 0x195   :  { %v387_v10 = vpack.c.bf16 %v386_v9, %v386_v9 }
 0x197   :  { %v381_v11 = vpop.f32.mrf.mxu0  ;;  %1559 = vmatmul.msk.bf16.vlgmr.msra.gmra.mxu1 %vm366_vm0, %v387_v10 }
 0x214   :  { %v412_v21 = vpop.f32.mrf.mxu1 }
 0x215   :  { %v413_v22 = vadd.f32 %v1876_v20, %v412_v21 }
 0x217   :  { %v417_v23 = vsel %vm416_vm2, %v413_v22, 0.0  ;;  %v424_v24 = vmul.f32 %v413_v22, %v413_v22 }
 0x218   :  { %v418_v25 = vrot.slane %v417_v23, 4 }
 0x219   :  { %v425_v26 = vsel %vm416_vm2, %v424_v24, 0.0 }
 0x21a   :  { %v419_v27 = vadd.f32 %v418_v25, %v417_v23  ;;  %v426_v28 = vrot.slane %v425_v26, 4 }
 0x21c   :  { %v420_v29 = vrot.slane %v419_v27, 2  ;;  %v427_v30 = vadd.f32 %v426_v28, %v425_v26  ;;  %v414_v31 = vpop.f32.mrf.mxu1 }
 0x21e   :  { %v421_v32 = vadd.f32 %v420_v29, %v419_v27  ;;  %v428_v33 = vrot.slane %v427_v30, 2 }
 0x220   :  { %v422_v34 = vrot.slane %v421_v32, 1  ;;  %v429_v35 = vadd.f32 %v428_v33, %v427_v30  ;;  %v590_v33 = vld [vmem:[#allocation6] sm:$0x3] }
 0x221   :  { %vm596_vm1 = vweird.f32 %v590_v33  ;;  %v600_v40 = vand.u32 2147483647, %v590_v33 }
 0x222   :  { %v430_v36 = vrot.slane %v429_v35, 1  ;;  %v423_v37 = vadd.f32 %v422_v34, %v421_v32 }
 0x224   :  { %v431_v38 = vadd.f32 %v430_v36, %v429_v35 }
 0x226   :  { %v433_v39 = vsel %vm432_vm3, %v423_v37, %v431_v38  ;;  %v602_v38 = vand.u32 2147483648, %v590_v33 }
 0x227   :  { %1560 = vmatmul.msk.f32.vlgmr.msra.gmra.mxu2 %vm442_vm4, %v433_v39 }
 0x2aa   :  { %v463_v41 = vpop.f32.mrf.mxu2 }
 0x2ab   :  { %v466_v42 = vmul.f32 0.03125, %v463_v41  ;;  %v603_v41 = vor.u32 1.1754944e-38, %v602_v38 }
 0x2ad   :  { %1562 = vmatmul.msk.f32.vlgmr.msra.gmra.mxu3 %vm468_vm6, %v466_v42 }
 0x330   :  { %v493_v46 = vpop.f32.mrf.mxu3 }
 0x331   :  { %v496_v47 = vmul.f32 %v493_v46, %v493_v46  ;;  %v502_v58 = vperm.slane %v493_v46, 0 }
 0x333   :  { %v498_v49 = vrot.slane %v496_v47, 7  ;;  %v503_v61 = vsub.f32 %v413_v22, %v502_v58  ;;  %v641_v47 = vld [vmem:[#allocation5] sm:$0x3] }
 0x335   :  { %v500_v50 = vsub.f32 %v493_v46, %v498_v49  ;;  %v680_v49 = vld [vmem:[%s2726_s26] sm:$0xf] }
 0x337   :  { %v501_v51 = vmax.f32 %v500_v50, 0.0 }
 0x339   :  { %v504_v52 = vadd.f32 1e-05, %v501_v51  ;;  %v689_v51 = vsel %vm472_vm5, %v680_v49, 0  ;;  %v1878_v49 = vld [vmem:[#allocation15] ss:$0 sm:$0xff] }
 0x33a   :  { %698 = vmatpush.bf16.msrb.mxu3 %v689_v51 }
 0x33b   :  { %1880 = vrsqrt.f32 %v504_v52  ;;  %vm511_vm8 = vweird.f32 %v504_v52 }
 0x341   :  { %v1881_v53 = vpop.eup %1880 }
 0x342   :  { %v506_v54 = vmul.f32 %v1881_v53, %v504_v52  ;;  %vm512_vm7 = vweird.f32 %v1881_v53 }
 0x343   :  { %vm513_vm9 = vmor %vm511_vm8, %vm512_vm7  ;;  %vm601_vm8 = vcmp.eq.f32.partialorder %v600_v40, 8.507059e+37 }
 0x344   :  { %v507_v55 = vmul.f32 %v1881_v53, %v506_v54 }
 0x346   :  { %v508_v56 = vmul.f32 0.5, %v507_v55 }
 0x348   :  { %v509_v57 = vsub.f32 1.5, %v508_v56 }
 0x34a   :  { %v510_v59 = vmul.f32 %v1881_v53, %v509_v57 }
 0x34c   :  { %v514_v60 = vsel %vm513_vm9, %v1881_v53, %v510_v59 }
 0x34d   :  { %v515_v62 = vperm.slane %v514_v60, 1 }
 0x34f   :  { %v516_v0 = vmul.f32 %v515_v62, %v503_v61 }
 0x351   :  { %v519_v1 = vmul.f32 %v518_v63, %v516_v0  ;;  %vm517_vm10 = vcmp.ge.f32.partialorder %v516_v0, 0.0 }
 0x353   :  { %v520_v2 = vsel %vm517_vm10, %v516_v0, %v519_v1 }
 0x354   :  { %v521_v3 = vpack.c.bf16 %v520_v2, %v520_v2 }
 0x356   :  { %1579 = vmatmul.msk.bf16.vlgmr.msrb.gmra.mxu1 %vm442_vm4, %v521_v3 }
 0x3d3   :  { %v570_v5 = vpop.f32.mrf.mxu1 }
 0x3d4   :  { %v2603_v6 = vadd.f32 %v1877_v4, %v570_v5 }
 0x3d6   :  { %v575_v7 = vand.u32 2147483647, %v2603_v6  ;;  %v574_v19 = vmax.f32 %v2603_v6, 0.0 }
 0x3d8   :  { %v576_v8 = vsub.f32 0.0, %v575_v7 }
 0x3da   :  { %v577_v9 = vmul.f32 1.442695, %v576_v8  ;;  %v674_v8 = vld [vmem:[%s2727_s0] sm:$0x3] }
 0x3db   :  { %v572_v10 = vpop.f32.mrf.mxu1 }
 0x3dc   :  { %1882 = vpow2.f32 %v577_v9 }
 0x3e2   :  { %v1883_v11 = vpop.eup %1882 }
 0x3e3   :  { %v579_v12 = vadd.f32 1.0, %v1883_v11  ;;  %v582_v13 = vmul.f32 -0.5, %v1883_v11  ;;  %v585_v15 = vand.u32 2147483647, %v1883_v11 }
 0x3e5   :  { %1884 = vlog2.f32 %v579_v12  ;;  %v583_v14 = vadd.f32 1.0, %v582_v13  ;;  %vm586_vm11 = vcmp.lt.f32.partialorder %v585_v15, 0.0004427343  ;;  %v1785_v15 = vld [vmem:[#allocation17 + $0x34] sm:$0xf0] }
 0x3e7   :  { %v584_v18 = vmul.f32 %v1883_v11, %v583_v14  ;;  %v1609_v14 = vld [vmem:[#allocation17 + $0x30] sm:$0xf] }
 0x3eb   :  { %v1885_v16 = vpop.eup %1884 }
 0x3ec   :  { %v581_v17 = vmul.f32 0.6931472, %v1885_v16  ;;  %v1784_v16 = vld [vmem:[#allocation17 + $0x34] sm:$0xf] }
 0x3ee   :  { %v587_v20 = vsel %vm586_vm11, %v584_v18, %v581_v17  ;;  %v1610_v17 = vor.u32 %v1785_v15, %v1609_v14  ;;  %v1611_v18 = vld [vmem:[#allocation17 + $0x38] sm:$0xf0] }
 0x3ef   :  { %v588_v21 = vadd.f32 %v587_v20, %v574_v19  ;;  %v1601_v19 = vld [vmem:[#allocation17 + $0x20] sm:$0xf]  ;;  %v1783_v20 = vld [vmem:[#allocation17 + $0x24] sm:$0xf0] }
 0x3f0   :  { %770 = vmatpush.bf16.msra.mxu1 %v1610_v17 }
 0x3f1   :  { %v2607_v22 = vadd.f32 1e-08, %v588_v21  ;;  %v1614_v21 = vor.u32 %v1784_v16, %v1611_v18 }
 0x3f3   :  { %1886 = vrcp.f32 %v2607_v22  ;;  %v617_v26 = vand.u32 2147483648, %v2607_v22  ;;  %v615_v28 = vand.u32 2147483647, %v2607_v22  ;;  %vm611_vm13 = vweird.f32 %v2607_v22  ;;  %783 = vmatpush.bf16.msrb.mxu2 %v1614_v21 }
 0x3f4   :  { %1888 = vrcp.f32 %v590_v33 }
 0x3f5   :  { %v618_v30 = vor.u32 1.1754944e-38, %v617_v26  ;;  %vm616_vm15 = vcmp.eq.f32.partialorder %v615_v28, 8.507059e+37 }
 0x3f9   :  { %v1887_v23 = vpop.eup %1886 }
 0x3fa   :  { %v607_v24 = vmul.f32 %v1887_v23, %v2607_v22  ;;  %vm612_vm12 = vweird.f32 %v1887_v23  ;;  %v1889_v34 = vpop.eup %1888 }
 0x3fb   :  { %vm613_vm14 = vmor %vm611_vm13, %vm612_vm12  ;;  %v592_v35 = vmul.f32 %v1889_v34, %v590_v33  ;;  %vm597_vm6 = vweird.f32 %v1889_v34  ;;  %v1593_v33 = vld [vmem:[#allocation17 + $0x10] sm:$0xf] }
 0x3fc   :  { %v608_v25 = vsub.f32 1.0, %v607_v24  ;;  %vm598_vm7 = vmor %vm596_vm1, %vm597_vm6  ;;  %v1603_v24 = vld [vmem:[#allocation17 + $0x28] sm:$0xf0]  ;;  %vm657_vm1 = vcmask 195584   ;;  %vm659_vm6 = vcmask 261120  }
 0x3fd   :  { %v593_v36 = vsub.f32 1.0, %v592_v35  ;;  %v1780_v35 = vld [vmem:[#allocation17 + $0x14] sm:$0xf] }
 0x3fe   :  { %v609_v27 = vmul.f32 %v1887_v23, %v608_v25  ;;  %v1602_v25 = vor.u32 %v1783_v20, %v1601_v19 }
 0x3ff   :  { %v594_v37 = vmul.f32 %v1889_v34, %v593_v36 }
 0x400   :  { %v610_v29 = vadd.f32 %v1887_v23, %v609_v27  ;;  %771 = vmatpush.bf16.msra.mxu1 %v1602_v25 }
 0x401   :  { %v595_v39 = vadd.f32 %v1889_v34, %v594_v37  ;;  %v1595_v37 = vld [vmem:[#allocation17 + $0x18] sm:$0xf0] }
 0x402   :  { %v614_v31 = vsel %vm613_vm14, %v1887_v23, %v610_v29  ;;  %v1782_v23 = vld [vmem:[#allocation17 + $0x24] sm:$0xf]  ;;  %v1598_v38 = vor.u32 %v1780_v35, %v1595_v37 }
 0x403   :  { %v619_v32 = vsel %vm616_vm15, %v618_v30, %v614_v31  ;;  %v599_v42 = vsel %vm598_vm7, %v1889_v34, %v595_v39  ;;  %vm654_vm15 = vcmask 64512   ;;  %v1606_v26 = vor.u32 %v1782_v23, %v1603_v24  ;;  %v1781_v34 = vld [vmem:[#allocation17 + $0x14] sm:$0xf0]  ;;  %v1585_v39 = vld [vmem:[#allocation17] sm:$0xf] }
 0x404   :  { %622 = vrot.lane.b32.xlu0 %v619_v32, %s2354_s24  ;;  %v604_v43 = vsel %vm601_vm8, %v603_v41, %v599_v42  ;;  %v655_v27 = vsel %vm654_vm15, %v2603_v6, %v2607_v22  ;;  %v1594_v36 = vor.u32 %v1781_v34, %v1593_v33  ;;  %v1778_v22 = vld [vmem:[#allocation17 + $0x4] sm:$0xf]  ;;  %v1587_v41 = vld [vmem:[#allocation17 + $0x8] sm:$0xf0]  ;;  %vm902_vm8 = vcmask 1042432  }
 0x405   :  { %v642_v52 = vmul.f32 %v641_v47, %v604_v43  ;;  %784 = vmatpush.bf16.msrb.mxu2 %v1606_v26  ;;  %v1590_v42 = vor.u32 %v1778_v22, %v1587_v41  ;;  %v836_v47 = vld [vmem:[#allocation20 + $0x58] sm:$0xff] }
 0x406   :  { %772 = vmatpush.bf16.msra.mxu1 %v1594_v36 }
 0x409   :  { %785 = vmatpush.bf16.msrb.mxu2 %v1598_v38 }
 0x40d   :  { %786 = vmatpush.bf16.msrb.mxu2 %v1590_v42 }
 0x476   :  { %v623_v44 = vpop.permute.xlu0 %622 }
 0x477   :  { %v625_v45 = vadd.f32 %v623_v44, %v604_v43  ;;  %v643_v56 = vmul.f32 %v623_v44, %v2603_v6  ;;  %v1779_v6 = vld [vmem:[#allocation17 + $0x4] sm:$0xf0]  ;;  %v840_v43 = vld [vmem:[#allocation20 + $0x78] sm:$0xff]  ;;  %v839_v44 = vld [vmem:[#allocation20 + $0x70] sm:$0xff] }
 0x478   :  { %v1586_v40 = vor.u32 %v1779_v6, %v1585_v39  ;;  %852 = vmatpush.msra.mxu3 %v840_v43 }
 0x479   :  { %1890 = vrcp.f32 %v625_v45  ;;  %v637_v53 = vand.u32 2147483648, %v625_v45  ;;  %v635_v55 = vand.u32 2147483647, %v625_v45  ;;  %vm631_vm10 = vweird.f32 %v625_v45 }
 0x47a   :  { %v644_v60 = vadd.f32 %v643_v56, %v642_v52  ;;  %773 = vmatpush.bf16.msra.mxu1 %v1586_v40  ;;  %853 = vmatpush.msra.mxu3 %v839_v44 }
 0x47b   :  { %v638_v58 = vor.u32 1.1754944e-38, %v637_v53  ;;  %vm636_vm12 = vcmp.eq.f32.partialorder %v635_v55, 8.507059e+37 }
 0x47f   :  { %v1891_v46 = vpop.eup %1890 }
 0x480   :  { %v627_v48 = vmul.f32 %v1891_v46, %v625_v45  ;;  %vm632_vm9 = vweird.f32 %v1891_v46  ;;  %v838_v45 = vld [vmem:[#allocation20 + $0x68] sm:$0xff] }
 0x481   :  { %vm633_vm11 = vmor %vm631_vm10, %vm632_vm9  ;;  %854 = vmatpush.msra.mxu3 %v838_v45  ;;  %vm792_vm9 = vcmask 1041408  }
 0x482   :  { %v628_v50 = vsub.f32 1.0, %v627_v48  ;;  %v835_v48 = vld [vmem:[#allocation20 + $0x50] sm:$0xff] }
 0x484   :  { %v629_v54 = vmul.f32 %v1891_v46, %v628_v50 }
 0x486   :  { %v630_v57 = vadd.f32 %v1891_v46, %v629_v54 }
 0x488   :  { %v634_v59 = vsel %vm633_vm11, %v1891_v46, %v630_v57  ;;  %v837_v46 = vld [vmem:[#allocation20 + $0x60] sm:$0xff]  ;;  %v834_v57 = vld [vmem:[#allocation20 + $0x48] sm:$0xff] }
 0x489   :  { %v639_v61 = vsel %vm636_vm12, %v638_v58, %v634_v59  ;;  %855 = vmatpush.msra.mxu3 %v837_v46  ;;  %v833_v58 = vld [vmem:[#allocation20 + $0x40] sm:$0xff]  ;;  %v832_v59 = vld [vmem:[#allocation20 + $0x38] sm:$0xff] }
 0x48a   :  { %651 = vrot.lane.b32.xlu2 %v639_v61, %s2355_s20  ;;  %v645_v62 = vmul.f32 %v644_v60, %v639_v61  ;;  %1892 = vrsqrt.f32 %v639_v61  ;;  %vm669_vm13 = vcmp.eq.f32.partialorder %v639_v61, inf  ;;  %v672_v7 = vand.u32 2147483648, %v639_v61  ;;  %v831_v60 = vld [vmem:[#allocation20 + $0x30] sm:$0xff] }
 0x48b   :  { %vm671_vm14 = vcmp.eq.f32.partialorder %v639_v61, 0.0  ;;  %856 = vmatpush.msra.mxu3 %v836_v47 }
 0x48c   :  { %647 = vrot.lane.b32.xlu1 %v645_v62, %s2356_s1 }
 0x48d   :  { %857 = vmatpush.msra.mxu3 %v835_v48 }
 0x48f   :  { %858 = vmatpush.msra.mxu3 %v834_v57 }
 0x490   :  { %v1893_v63 = vpop.eup %1892 }
 0x491   :  { %v663_v0 = vmul.f32 %v1893_v63, %v639_v61  ;;  %859 = vmatpush.msra.mxu3 %v833_v58 }
 0x493   :  { %v664_v1 = vmul.f32 %v1893_v63, %v663_v0  ;;  %860 = vmatpush.msra.mxu3 %v832_v59  ;;  %v847_v0 = vld [vmem:[#allocation20 + $0xb0] sm:$0xff]  ;;  %v1793_v59 = vld [vmem:[%s2729_s2 + $0x38] sm:$0xff] }
 0x494   :  { %1101 = vmatpush.bf16.msra.mxu2 %v1793_v59 }
 0x495   :  { %v665_v2 = vmul.f32 0.5, %v664_v1  ;;  %861 = vmatpush.msra.mxu3 %v831_v60  ;;  %v828_v1 = vld [vmem:[#allocation20 + $0x18] sm:$0xff] }
 0x496   :  { %v1792_v60 = vld [vmem:[%s2729_s2 + $0x30] sm:$0xff] }
 0x497   :  { %v666_v3 = vsub.f32 1.5, %v665_v2  ;;  %v846_v2 = vld [vmem:[#allocation20 + $0xa8] sm:$0xff] }
 0x498   :  { %1102 = vmatpush.bf16.msra.mxu2 %v1792_v60 }
 0x499   :  { %v667_v4 = vmul.f32 %v1893_v63, %v666_v3  ;;  %v829_v63 = vld [vmem:[#allocation20 + $0x20] sm:$0xff]  ;;  %v827_v3 = vld [vmem:[#allocation20 + $0x10] sm:$0xff] }
 0x49b   :  { %v668_v5 = vmul.f32 %v667_v4, %v639_v61  ;;  %v845_v4 = vld [vmem:[#allocation20 + $0xa0] sm:$0xff] }
 0x49d   :  { %v670_v9 = vsel %vm669_vm13, %v639_v61, %v668_v5  ;;  %v830_v61 = vld [vmem:[#allocation20 + $0x28] sm:$0xff] }
 0x49e   :  { %v673_v10 = vsel %vm671_vm14, %v672_v7, %v670_v9  ;;  %862 = vmatpush.msra.mxu3 %v830_v61  ;;  %v826_v5 = vld [vmem:[#allocation20 + $0x8] sm:$0xff]  ;;  %v844_v7 = vld [vmem:[#allocation20 + $0x98] sm:$0xff]  ;;  %v843_v9 = vld [vmem:[#allocation20 + $0x90] sm:$0xff] }
 0x49f   :  { %v675_v11 = vmul.f32 %v674_v8, %v673_v10  ;;  %v825_v8 = vld [vmem:[#allocation20] sm:$0xff]  ;;  %v842_v10 = vld [vmem:[#allocation20 + $0x88] sm:$0xff]  ;;  %v1791_v61 = vld [vmem:[%s2729_s2 + $0x28] sm:$0xff] }
 0x4a0   :  { %863 = vmatpush.msra.mxu3 %v829_v63  ;;  %1103 = vmatpush.bf16.msra.mxu2 %v1791_v61  ;;  %v1789_v63 = vld [vmem:[%s2729_s2 + $0x18] sm:$0xff] }
 0x4a1   :  { %v676_v12 = vadd.f32 %v675_v11, %v645_v62  ;;  %v848_v62 = vld [vmem:[#allocation20 + $0xb8] sm:$0xff]  ;;  %v841_v11 = vld [vmem:[#allocation20 + $0x80] sm:$0xff] }
 0x4a2   :  { %880 = vmatpush.msrb.mxu0 %v848_v62  ;;  %864 = vmatpush.msra.mxu3 %v828_v1  ;;  %v1790_v62 = vld [vmem:[%s2729_s2 + $0x20] sm:$0xff]  ;;  %v1797_v1 = vld [vmem:[%s2729_s2 + $0x58] sm:$0xff] }
 0x4a3   :  { %v679_v13 = vpack.c.bf16 %v676_v12, %v676_v12  ;;  %v893_v12 = vld [vmem:[%s2728_s21] sm:$0x77]  ;;  %1118 = vmatpush.bf16.msrb.mxu1 %v1797_v1 }
 0x4a4   :  { %881 = vmatpush.msrb.mxu0 %v847_v0  ;;  %865 = vmatpush.msra.mxu3 %v827_v3  ;;  %895 = vst [vmem:[#allocation1] ss:$2 sm:$0xff] %v893_v12  ;;  %v1788_v0 = vld [vmem:[%s2729_s2 + $0x10] sm:$0xff] }
 0x4a5   :  { %1582 = vmatmul.msk.bf16.vlgmr.msrb.gmra.mxu3 %vm654_vm15, %v679_v13  ;;  %v717_v13 = vld [vmem:[#allocation18] sm:$0x3]  ;;  %1104 = vmatpush.bf16.msra.mxu2 %v1790_v62 }
 0x4a6   :  { %882 = vmatpush.msrb.mxu0 %v846_v2  ;;  %866 = vmatpush.msra.mxu3 %v826_v5  ;;  %v719_v14 = vperm.slane %v717_v13, 0  ;;  %v720_v20 = vperm.slane %v717_v13, 1  ;;  %v1787_v2 = vld [vmem:[%s2729_s2 + $0x8] sm:$0xff]  ;;  %v1796_v5 = vld [vmem:[%s2729_s2 + $0x50] sm:$0xff] }
 0x4a7   :  { %1119 = vmatpush.bf16.msrb.mxu1 %v1796_v5 }
 0x4a8   :  { %883 = vmatpush.msrb.mxu0 %v845_v4  ;;  %867 = vmatpush.msra.mxu3 %v825_v8 }
 0x4a9   :  { %1105 = vmatpush.bf16.msra.mxu2 %v1789_v63 }
 0x4aa   :  { %884 = vmatpush.msrb.mxu0 %v844_v7  ;;  %v1786_v7 = vld [vmem:[%s2729_s2] sm:$0xff] }
 0x4ab   :  { %v896_v17 = vld.sshfl [vmem:[#allocation1] sm:$0xff pattern:$0x75316420] }
 0x4ac   :  { %885 = vmatpush.msrb.mxu0 %v843_v9 }
 0x4ad   :  { %1106 = vmatpush.bf16.msra.mxu2 %v1788_v0 }
 0x4ae   :  { %886 = vmatpush.msrb.mxu0 %v842_v10  ;;  %v1795_v10 = vld [vmem:[%s2729_s2 + $0x48] sm:$0xff] }
 0x4af   :  { %1120 = vmatpush.bf16.msrb.mxu1 %v1795_v10 }
 0x4b0   :  { %887 = vmatpush.msrb.mxu0 %v841_v11 }
 0x4b1   :  { %1107 = vmatpush.bf16.msra.mxu2 %v1787_v2 }
 0x4b2   :  { %1618 = vmatpush.msk.msra.mxu0 %vm902_vm8, %v896_v17 }
 0x4b5   :  { %1108 = vmatpush.bf16.msra.mxu2 %v1786_v7 }
 0x4e4   :  { %v652_v29 = vpop.permute.xlu2 %651 }
 0x4fe   :  { %v648_v28 = vpop.permute.xlu1 %647 }
 0x4ff   :  { %v656_v30 = vsel %vm366_vm0, %v655_v27, %v648_v28 }
 0x500   :  { %v658_v31 = vsel %vm657_vm1, %v656_v30, %v652_v29 }
 0x501   :  { %v660_v32 = vsel %vm659_vm6, %v658_v31, 0.0 }
 0x502   :  { %661 = vst [vmem:[%s2505_s25] sm:$0x3] %v660_v32  ;;  %s1580_s25 = sld [smem:[#allocation2 + $0x2]] }
 0x508   :  { %v705_v51 = vstv %s1580_s25 }
 0x528   :  { %v700_v50 = vpop.f32.mrf.mxu3 }
 0x529   :  { %v701_v52 = vadd.f32 %v1878_v49, %v700_v50 }
 0x52b   :  { %vm704_vm7 = vcmp.ge.f32.partialorder %v701_v52, 0.0  ;;  %v706_v53 = vmul.f32 %v705_v51, %v701_v52 }
 0x52d   :  { %v707_v54 = vsel %vm704_vm7, %v701_v52, %v706_v53 }
 0x52e   :  { %v708_v55 = vpack.c.bf16 %v707_v54, %v707_v54  ;;  %v897_v54 = vld.sshfl [vmem:[#allocation1 + $0x8] sm:$0xff pattern:$0x75316420] }
 0x530   :  { %v702_v56 = vpop.f32.mrf.mxu3  ;;  %1615 = vmatmul.msk.bf16.vlgmr.msra.gmra.mxu1 %vm442_vm4, %v708_v55  ;;  %1616 = vmatmul.msk.bf16.vlgmr.msrb.gmra.mxu2 %vm442_vm4, %v708_v55 }
 0x5ad   :  { %v775_v15 = vpop.f32.mrf.mxu1 }
 0x5ae   :  { %v2632_v16 = vadd.f32 %v775_v15, %v719_v14  ;;  %v1794_v15 = vld [vmem:[%s2729_s2 + $0x40] sm:$0xff] }
 0x5af   :  { %1121 = vmatpush.bf16.msrb.mxu1 %v1794_v15 }
 0x5b0   :  { %v793_v18 = vsel %vm792_vm9, %v2632_v16, 0.0  ;;  %v807_v19 = vmul.f32 %v2632_v16, %v2632_v16 }
 0x5b1   :  { %v794_v21 = vrot.slane %v793_v18, 4 }
 0x5b2   :  { %v809_v23 = vsel %vm792_vm9, %v807_v19, 0.0 }
 0x5b3   :  { %v795_v24 = vadd.f32 %v794_v21, %v793_v18  ;;  %v810_v25 = vrot.slane %v809_v23, 4  ;;  %v788_v26 = vpop.f32.mrf.mxu2 }
 0x5b4   :  { %v2640_v27 = vadd.f32 %v788_v26, %v720_v20 }
 0x5b5   :  { %v796_v28 = vrot.slane %v795_v24, 2  ;;  %v811_v29 = vadd.f32 %v810_v25, %v809_v23  ;;  %v777_v30 = vpop.f32.mrf.mxu1 }
 0x5b6   :  { %v800_v31 = vsel %vm416_vm2, %v2640_v27, 0.0  ;;  %v808_v32 = vmul.f32 %v2640_v27, %v2640_v27 }
 0x5b7   :  { %v797_v33 = vadd.f32 %v796_v28, %v795_v24  ;;  %v812_v34 = vrot.slane %v811_v29, 2  ;;  %v801_v35 = vrot.slane %v800_v31, 4 }
 0x5b8   :  { %v816_v36 = vsel %vm416_vm2, %v808_v32, 0.0  ;;  %vm898_vm2 = vcmask 23552  }
 0x5b9   :  { %v802_v37 = vadd.f32 %v801_v35, %v800_v31  ;;  %v817_v38 = vrot.slane %v816_v36, 4  ;;  %v798_v39 = vrot.slane %v797_v33, 1  ;;  %v813_v6 = vadd.f32 %v812_v34, %v811_v29 }
 0x5bb   :  { %v803_v22 = vrot.slane %v802_v37, 2  ;;  %v818_v40 = vadd.f32 %v817_v38, %v816_v36  ;;  %v790_v41 = vpop.f32.mrf.mxu2  ;;  %v814_v42 = vrot.slane %v813_v6, 1  ;;  %v799_v45 = vadd.f32 %v798_v39, %v797_v33 }
 0x5bc   :  { %v991_v36 = vstv %s2663_s7 }
 0x5bd   :  { %v804_v43 = vadd.f32 %v803_v22, %v802_v37  ;;  %v819_v44 = vrot.slane %v818_v40, 2  ;;  %v815_v46 = vadd.f32 %v814_v42, %v813_v6 }
 0x5bf   :  { %v823_v47 = vsel %vm432_vm3, %v799_v45, %v815_v46  ;;  %v805_v48 = vrot.slane %v804_v43, 1  ;;  %v820_v49 = vadd.f32 %v819_v44, %v818_v40 }
 0x5c0   :  { %868 = vmatmul.f32.vlgmr.msra.gmra.mxu3 %v823_v47 }
 0x5c1   :  { %v821_v50 = vrot.slane %v820_v49, 1  ;;  %v806_v51 = vadd.f32 %v805_v48, %v804_v43 }
 0x5c3   :  { %v822_v52 = vadd.f32 %v821_v50, %v820_v49  ;;  %v1879_v49 = vld [vmem:[#allocation21] ss:$0 sm:$0xff] }
 0x5c5   :  { %v824_v53 = vsel %vm432_vm3, %v806_v51, %v822_v52 }
 0x5c6   :  { %1617 = vmatmul.msk.f32.vlgmr.msrb.gmra.mxu0 %vm442_vm4, %v824_v53 }
 0x5c7   :  { %1620 = vmatpush.msk.msrb.mxu0 %vm902_vm8, %v897_v54 }
 0x643   :  { %v869_v55 = vpop.f32.mrf.mxu3  ;;  %v889_v56 = vpop.f32.mrf.mxu0 }
 0x644   :  { %v890_v57 = vadd.f32 %v889_v56, %v869_v55 }
 0x646   :  { %v892_v58 = vmul.f32 0.0078125, %v890_v57 }
 0x648   :  { %1619 = vmatmul.msk.f32.vlgmr.msra.gmra.mxu0 %vm898_vm2, %v892_v58 }
 0x650   :  { %1621 = vmatmul.msk.f32.vlgmr.msrb.gmra.mxu0 %vm898_vm2, %v892_v58 }
 0x6c5   :  { %v924_v3 = vpop.f32.mrf.mxu0 }
 0x6c6   :  { %v947_v4 = vmul.f32 %v924_v3, %v924_v3  ;;  %v959_v29 = vperm.slane %v924_v3, 0 }
 0x6c8   :  { %v951_v8 = vrot.slane %v947_v4, 7  ;;  %v961_v34 = vsub.f32 %v2632_v16, %v959_v29 }
 0x6ca   :  { %v955_v9 = vsub.f32 %v924_v3, %v951_v8 }
 0x6cc   :  { %v957_v11 = vmax.f32 %v955_v9, 0.0 }
 0x6cd   :  { %v944_v12 = vpop.f32.mrf.mxu0 }
 0x6ce   :  { %v963_v13 = vadd.f32 1e-05, %v957_v11  ;;  %v948_v14 = vmul.f32 %v944_v12, %v944_v12  ;;  %v960_v22 = vperm.slane %v944_v12, 0 }
 0x6d0   :  { %1894 = vrsqrt.f32 %v963_v13  ;;  %v952_v17 = vrot.slane %v948_v14, 7  ;;  %vm971_vm10 = vweird.f32 %v963_v13  ;;  %v962_v44 = vsub.f32 %v2640_v27, %v960_v22 }
 0x6d2   :  { %v956_v18 = vsub.f32 %v944_v12, %v952_v17 }
 0x6d4   :  { %v958_v19 = vmax.f32 %v956_v18, 0.0  ;;  %v1143_v18 = vld [vmem:[#allocation14] sm:$0x3] }
 0x6d6   :  { %v1895_v20 = vpop.eup %1894  ;;  %v964_v21 = vadd.f32 1e-05, %v958_v19 }
 0x6d7   :  { %v966_v23 = vmul.f32 %v1895_v20, %v963_v13  ;;  %vm972_vm3 = vweird.f32 %v1895_v20 }
 0x6d8   :  { %1896 = vrsqrt.f32 %v964_v21  ;;  %vm973_vm11 = vmor %vm971_vm10, %vm972_vm3  ;;  %vm981_vm14 = vweird.f32 %v964_v21 }
 0x6d9   :  { %v967_v24 = vmul.f32 %v1895_v20, %v966_v23 }
 0x6db   :  { %v968_v25 = vmul.f32 0.5, %v967_v24  ;;  %v1155_v24 = vand.u32 2147483648, %v1143_v18 }
 0x6dd   :  { %v969_v26 = vsub.f32 1.5, %v968_v25 }
 0x6de   :  { %v1897_v28 = vpop.eup %1896 }
 0x6df   :  { %v970_v30 = vmul.f32 %v1895_v20, %v969_v26  ;;  %v976_v31 = vmul.f32 %v1897_v28, %v964_v21  ;;  %vm982_vm12 = vweird.f32 %v1897_v28  ;;  %v1153_v26 = vand.u32 2147483647, %v1143_v18 }
 0x6e0   :  { %vm983_vm7 = vmor %vm981_vm14, %vm982_vm12 }
 0x6e1   :  { %v974_v32 = vsel %vm973_vm11, %v1895_v20, %v970_v30  ;;  %v977_v33 = vmul.f32 %v1897_v28, %v976_v31 }
 0x6e2   :  { %v985_v35 = vperm.slane %v974_v32, 1 }
 0x6e3   :  { %v978_v37 = vmul.f32 0.5, %v977_v33  ;;  %v1229_v33 = vld [vmem:[#allocation23] sm:$0xff] }
 0x6e4   :  { %v987_v38 = vmul.f32 %v985_v35, %v961_v34  ;;  %v1238_v34 = vunpack.c.h.b16 %v1229_v33  ;;  %v1237_v35 = vunpack.c.l.b16 %v1229_v33  ;;  %v1821_v33 = vld [vmem:[#allocation26 + $0xb4] sm:$0xf0] }
 0x6e5   :  { %v979_v39 = vsub.f32 1.5, %v978_v37  ;;  %v1194_v37 = vld [vmem:[#allocation12] sm:$0x3] }
 0x6e6   :  { %v992_v6 = vmul.f32 %v991_v36, %v987_v38  ;;  %vm989_vm13 = vcmp.ge.f32.partialorder %v987_v38, 0.0 }
 0x6e7   :  { %v980_v40 = vmul.f32 %v1897_v28, %v979_v39  ;;  %v1240_v39 = vpack.c.b16 %v1238_v34, %v1238_v34 }
 0x6e8   :  { %v994_v41 = vsel %vm989_vm13, %v987_v38, %v992_v6  ;;  %vm1149_vm13 = vweird.f32 %v1143_v18  ;;  %v1239_v6 = vpack.c.b16 %v1237_v35, %v1237_v35 }
 0x6e9   :  { %v984_v42 = vsel %vm983_vm7, %v1897_v28, %v980_v40  ;;  %v996_v43 = vpack.c.bf16 %v994_v41, %v994_v41  ;;  %v1156_v28 = vor.u32 1.1754944e-38, %v1155_v24  ;;  %v1248_v40 = vsel %vm472_vm5, %v1240_v39, 0  ;;  %v1807_v24 = vld [vmem:[#allocation26 + $0x44] sm:$0xf0]  ;;  %v1804_v39 = vld [vmem:[#allocation26 + $0x34] sm:$0xf] }
 0x6ea   :  { %v986_v45 = vperm.slane %v984_v42, 1  ;;  %v1245_v41 = vsel %vm472_vm5, %v1239_v6, 0  ;;  %1270 = vmatpush.bf16.msrb.mxu3 %v1248_v40  ;;  %v1702_v6 = vld [vmem:[#allocation26 + $0x38] sm:$0xf0] }
 0x6eb   :  { %1109 = vmatmul.bf16.vlgmr.msra.gmra.mxu2 %v996_v43  ;;  %1257 = vmatpush.bf16.msra.mxu0 %v1245_v41  ;;  %v1705_v40 = vor.u32 %v1804_v39, %v1702_v6  ;;  %v1692_v41 = vld [vmem:[#allocation26 + $0x20] sm:$0xf] }
 0x6ec   :  { %v988_v16 = vmul.f32 %v986_v45, %v962_v44 }
 0x6ee   :  { %vm990_vm8 = vcmp.ge.f32.partialorder %v988_v16, 0.0  ;;  %v993_v46 = vmul.f32 %v991_v36, %v988_v16 }
 0x6f0   :  { %v995_v47 = vsel %vm990_vm8, %v988_v16, %v993_v46  ;;  %vm1154_vm8 = vcmp.eq.f32.partialorder %v1153_v26, 8.507059e+37  ;;  %v1820_v26 = vld [vmem:[#allocation26 + $0xb4] sm:$0xf] }
 0x6f1   :  { %v997_v48 = vpack.c.bf16 %v995_v47, %v995_v47 }
 0x6f3   :  { %1670 = vmatmul.msk.bf16.vlgmr.msrb.gmra.mxu1 %vm442_vm4, %v997_v48 }
 0x76e   :  { %v1110_v50 = vpop.f32.mrf.mxu2 }
 0x76f   :  { %v1111_v51 = vadd.f32 %v1879_v49, %v1110_v50 }
 0x770   :  { %v1123_v52 = vpop.f32.mrf.mxu1 }
 0x771   :  { %v2669_v53 = vadd.f32 %v1123_v52, %v1111_v51 }
 0x773   :  { %v1128_v54 = vand.u32 2147483647, %v2669_v53  ;;  %v1127_v2 = vmax.f32 %v2669_v53, 0.0 }
 0x775   :  { %v1129_v55 = vsub.f32 0.0, %v1128_v54 }
 0x776   :  { %v1112_v56 = vpop.f32.mrf.mxu2 }
 0x777   :  { %v1130_v27 = vmul.f32 1.442695, %v1129_v55 }
 0x778   :  { %v1125_v57 = vpop.f32.mrf.mxu1 }
 0x779   :  { %1898 = vpow2.f32 %v1130_v27 }
 0x77f   :  { %v1899_v58 = vpop.eup %1898 }
 0x780   :  { %v1132_v59 = vadd.f32 1.0, %v1899_v58  ;;  %v1135_v60 = vmul.f32 -0.5, %v1899_v58  ;;  %v1138_v62 = vand.u32 2147483647, %v1899_v58 }
 0x782   :  { %1900 = vlog2.f32 %v1132_v59  ;;  %v1136_v61 = vadd.f32 1.0, %v1135_v60  ;;  %vm1139_vm2 = vcmp.lt.f32.partialorder %v1138_v62, 0.0004427343  ;;  %v1224_v60 = vld [vmem:[%s2730_s14] sm:$0x3] }
 0x784   :  { %v1137_v1 = vmul.f32 %v1899_v58, %v1136_v61 }
 0x788   :  { %v1901_v63 = vpop.eup %1900 }
 0x789   :  { %v1134_v0 = vmul.f32 0.6931472, %v1901_v63 }
 0x78b   :  { %v1140_v3 = vsel %vm1139_vm2, %v1137_v1, %v1134_v0 }
 0x78c   :  { %v1141_v4 = vadd.f32 %v1140_v3, %v1127_v2  ;;  %v1732_v2 = vld [vmem:[#allocation26 + $0x70] sm:$0xf]  ;;  %v1813_v3 = vld [vmem:[#allocation26 + $0x74] sm:$0xf0] }
 0x78e   :  { %v2673_v5 = vadd.f32 1e-08, %v1141_v4  ;;  %v1812_v4 = vld [vmem:[#allocation26 + $0x74] sm:$0xf] }
 0x790   :  { %1902 = vrcp.f32 %v2673_v5  ;;  %v1170_v10 = vand.u32 2147483648, %v2673_v5  ;;  %v1168_v12 = vand.u32 2147483647, %v2673_v5  ;;  %vm1164_vm10 = vweird.f32 %v2673_v5 }
 0x791   :  { %1904 = vrcp.f32 %v1143_v18 }
 0x792   :  { %v1171_v14 = vor.u32 1.1754944e-38, %v1170_v10  ;;  %vm1169_vm12 = vcmp.eq.f32.partialorder %v1168_v12, 8.507059e+37  ;;  %v1811_v10 = vld [vmem:[#allocation26 + $0x64] sm:$0xf0]  ;;  %v1810_v12 = vld [vmem:[#allocation26 + $0x64] sm:$0xf] }
 0x796   :  { %v1903_v7 = vpop.eup %1902 }
 0x797   :  { %v1160_v8 = vmul.f32 %v1903_v7, %v2673_v5  ;;  %vm1165_vm3 = vweird.f32 %v1903_v7  ;;  %v1905_v19 = vpop.eup %1904 }
 0x798   :  { %vm1166_vm11 = vmor %vm1164_vm10, %vm1165_vm3  ;;  %v1145_v20 = vmul.f32 %v1905_v19, %v1143_v18  ;;  %vm1150_vm14 = vweird.f32 %v1905_v19  ;;  %v1809_v18 = vld [vmem:[#allocation26 + $0x54] sm:$0xf0] }
 0x799   :  { %v1161_v9 = vsub.f32 1.0, %v1160_v8  ;;  %vm1151_vm7 = vmor %vm1149_vm13, %vm1150_vm14  ;;  %v1734_v8 = vld [vmem:[#allocation26 + $0x78] sm:$0xf0] }
 0x79a   :  { %v1146_v21 = vsub.f32 1.0, %v1145_v20  ;;  %v1718_v20 = vld [vmem:[#allocation26 + $0x58] sm:$0xf0] }
 0x79b   :  { %v1162_v11 = vmul.f32 %v1903_v7, %v1161_v9  ;;  %v1724_v9 = vld [vmem:[#allocation26 + $0x60] sm:$0xf] }
 0x79c   :  { %v1147_v23 = vmul.f32 %v1905_v19, %v1146_v21 }
 0x79d   :  { %v1163_v13 = vadd.f32 %v1903_v7, %v1162_v11  ;;  %v1737_v11 = vor.u32 %v1812_v4, %v1734_v8  ;;  %v1816_v4 = vld [vmem:[#allocation26 + $0x94] sm:$0xf]  ;;  %v1748_v8 = vld [vmem:[#allocation26 + $0x90] sm:$0xf] }
 0x79e   :  { %v1148_v25 = vadd.f32 %v1905_v19, %v1147_v23  ;;  %v1708_v23 = vld [vmem:[#allocation26 + $0x40] sm:$0xf] }
 0x79f   :  { %v1167_v15 = vsel %vm1166_vm11, %v1903_v7, %v1163_v13  ;;  %v1733_v7 = vor.u32 %v1813_v3, %v1732_v2  ;;  %v1726_v13 = vld [vmem:[#allocation26 + $0x68] sm:$0xf0]  ;;  %1464 = vmatpush.bf16.msra.mxu3 %v1737_v11  ;;  %v1709_v35 = vor.u32 %v1807_v24, %v1708_v23 }
 0x7a0   :  { %v1172_v17 = vsel %vm1169_vm12, %v1171_v14, %v1167_v15  ;;  %v1152_v29 = vsel %vm1151_vm7, %v1905_v19, %v1148_v25  ;;  %v1725_v14 = vor.u32 %v1811_v10, %v1724_v9  ;;  %v1729_v15 = vor.u32 %v1810_v12, %v1726_v13  ;;  %v1808_v19 = vld [vmem:[#allocation26 + $0x54] sm:$0xf]  ;;  %v1678_v2 = vld [vmem:[#allocation26 + $0x8] sm:$0xf0]  ;;  %v1817_v10 = vld [vmem:[#allocation26 + $0x94] sm:$0xf0] }
 0x7a1   :  { %1175 = vrot.lane.b32.xlu0 %v1172_v17, %s2354_s24  ;;  %v1157_v30 = vsel %vm1154_vm8, %v1156_v28, %v1152_v29  ;;  %1438 = vmatpush.bf16.msrb.mxu0 %v1733_v7  ;;  %v1716_v17 = vld [vmem:[#allocation26 + $0x50] sm:$0xf]  ;;  %v1721_v25 = vor.u32 %v1808_v19, %v1718_v20  ;;  %v1766_v28 = vld [vmem:[#allocation26 + $0xb8] sm:$0xf0]  ;;  %v1749_v11 = vor.u32 %v1817_v10, %v1748_v8  ;;  %v1814_v12 = vld [vmem:[#allocation26 + $0x84] sm:$0xf] }
 0x7a2   :  { %v1195_v42 = vmul.f32 %v1194_v37, %v1157_v30  ;;  %v1717_v21 = vor.u32 %v1809_v18, %v1716_v17  ;;  %v1764_v29 = vld [vmem:[#allocation26 + $0xb0] sm:$0xf]  ;;  %v1750_v7 = vld [vmem:[#allocation26 + $0x98] sm:$0xf0]  ;;  %v1742_v13 = vld [vmem:[#allocation26 + $0x88] sm:$0xf0] }
 0x7a3   :  { %1465 = vmatpush.bf16.msra.mxu3 %v1729_v15  ;;  %v1765_v34 = vor.u32 %v1821_v33, %v1764_v29  ;;  %v1700_v37 = vld [vmem:[#allocation26 + $0x30] sm:$0xf]  ;;  %v1753_v9 = vor.u32 %v1816_v4, %v1750_v7  ;;  %v1745_v15 = vor.u32 %v1814_v12, %v1742_v13  ;;  %v1815_v17 = vld [vmem:[#allocation26 + $0x84] sm:$0xf0]  ;;  %v1230_v19 = vld [vmem:[#allocation24] sm:$0x3] }
 0x7a4   :  { %v1232_v20 = vperm.slane %v1230_v19, 0 }
 0x7a5   :  { %1439 = vmatpush.bf16.msrb.mxu0 %v1725_v14  ;;  %1455 = vmatpush.bf16.msra.mxu1 %v1765_v34  ;;  %v1740_v14 = vld [vmem:[#allocation26 + $0x80] sm:$0xf] }
 0x7a6   :  { %v1741_v18 = vor.u32 %v1815_v17, %v1740_v14 }
 0x7a7   :  { %1466 = vmatpush.bf16.msra.mxu3 %v1721_v25 }
 0x7a9   :  { %1440 = vmatpush.bf16.msrb.mxu0 %v1717_v21 }
 0x7ad   :  { %1441 = vmatpush.bf16.msrb.mxu0 %v1709_v35 }
 0x813   :  { %v1176_v31 = vpop.permute.xlu0 %1175 }
 0x814   :  { %v1178_v32 = vadd.f32 %v1176_v31, %v1157_v30  ;;  %v1196_v16 = vmul.f32 %v1176_v31, %v2669_v53  ;;  %v1806_v30 = vld [vmem:[#allocation26 + $0x44] sm:$0xf]  ;;  %v1710_v31 = vld [vmem:[#allocation26 + $0x48] sm:$0xf0] }
 0x816   :  { %1906 = vrcp.f32 %v1178_v32  ;;  %v1190_v43 = vand.u32 2147483648, %v1178_v32  ;;  %v1188_v45 = vand.u32 2147483647, %v1178_v32  ;;  %vm1184_vm3 = vweird.f32 %v1178_v32 }
 0x817   :  { %v1197_v49 = vadd.f32 %v1196_v16, %v1195_v42  ;;  %v1803_v42 = vld [vmem:[#allocation26 + $0x24] sm:$0xf0] }
 0x818   :  { %v1191_v47 = vor.u32 1.1754944e-38, %v1190_v43  ;;  %vm1189_vm11 = vcmp.eq.f32.partialorder %v1188_v45, 8.507059e+37  ;;  %v1802_v43 = vld [vmem:[#allocation26 + $0x24] sm:$0xf]  ;;  %v1693_v45 = vor.u32 %v1803_v42, %v1692_v41 }
 0x81c   :  { %v1907_v36 = vpop.eup %1906 }
 0x81d   :  { %v1180_v38 = vmul.f32 %v1907_v36, %v1178_v32  ;;  %vm1185_vm2 = vweird.f32 %v1907_v36  ;;  %v1769_v32 = vor.u32 %v1820_v26, %v1766_v28  ;;  %v1233_v26 = vperm.slane %v1230_v19, 1 }
 0x81e   :  { %vm1186_vm10 = vmor %vm1184_vm3, %vm1185_vm2 }
 0x81f   :  { %v1181_v22 = vsub.f32 1.0, %v1180_v38  ;;  %1481 = vmatpush.bf16.msrb.mxu2 %v1769_v32  ;;  %v1805_v38 = vld [vmem:[#allocation26 + $0x34] sm:$0xf0] }
 0x821   :  { %v1182_v44 = vmul.f32 %v1907_v36, %v1181_v22  ;;  %v1701_v22 = vor.u32 %v1805_v38, %v1700_v37  ;;  %v1309_v38 = vld [vmem:[%s2500_s9] sm:$0x3] }
 0x823   :  { %v1183_v46 = vadd.f32 %v1907_v36, %v1182_v44  ;;  %v1694_v44 = vld [vmem:[#allocation26 + $0x28] sm:$0xf0]  ;;  %1442 = vmatpush.bf16.msrb.mxu0 %v1701_v22  ;;  %v1311_v22 = vperm.slane %v1309_v38, 0 }
 0x824   :  { %v1697_v16 = vor.u32 %v1802_v43, %v1694_v44 }
 0x825   :  { %v1187_v48 = vsel %vm1186_vm10, %v1907_v36, %v1183_v46  ;;  %v1713_v36 = vor.u32 %v1806_v30, %v1710_v31  ;;  %v1207_v46 = vsel %vm654_vm15, %v2669_v53, %v2673_v5  ;;  %v1819_v5 = vld [vmem:[#allocation26 + $0xa4] sm:$0xf0] }
 0x826   :  { %v1192_v50 = vsel %vm1189_vm11, %v1191_v47, %v1187_v48 }
 0x827   :  { %1204 = vrot.lane.b32.xlu2 %v1192_v50, %s2355_s20  ;;  %v1198_v51 = vmul.f32 %v1197_v49, %v1192_v50  ;;  %1908 = vrsqrt.f32 %v1192_v50  ;;  %vm1219_vm5 = vcmp.eq.f32.partialorder %v1192_v50, inf  ;;  %v1222_v59 = vand.u32 2147483648, %v1192_v50  ;;  %1467 = vmatpush.bf16.msra.mxu3 %v1713_v36 }
 0x828   :  { %vm1221_vm12 = vcmp.eq.f32.partialorder %v1192_v50, 0.0  ;;  %1443 = vmatpush.bf16.msrb.mxu0 %v1693_v45 }
 0x829   :  { %1200 = vrot.lane.b32.xlu1 %v1198_v51, %s2356_s1 }
 0x82b   :  { %1468 = vmatpush.bf16.msra.mxu3 %v1705_v40  ;;  %v1312_v40 = vperm.slane %v1309_v38, 1 }
 0x82d   :  { %v1909_v52 = vpop.eup %1908 }
 0x82e   :  { %v1213_v54 = vmul.f32 %v1909_v52, %v1192_v50 }
 0x82f   :  { %1469 = vmatpush.bf16.msra.mxu3 %v1697_v16 }
 0x830   :  { %v1214_v55 = vmul.f32 %v1909_v52, %v1213_v54  ;;  %v1801_v54 = vld [vmem:[#allocation26 + $0x14] sm:$0xf0] }
 0x832   :  { %v1215_v56 = vmul.f32 0.5, %v1214_v55 }
 0x834   :  { %v1216_v27 = vsub.f32 1.5, %v1215_v56  ;;  %v1800_v56 = vld [vmem:[#allocation26 + $0x14] sm:$0xf] }
 0x836   :  { %v1217_v57 = vmul.f32 %v1909_v52, %v1216_v27  ;;  %v1684_v52 = vld [vmem:[#allocation26 + $0x10] sm:$0xf]  ;;  %v1686_v27 = vld [vmem:[#allocation26 + $0x18] sm:$0xf0] }
 0x837   :  { %v1685_v55 = vor.u32 %v1801_v54, %v1684_v52 }
 0x838   :  { %v1218_v58 = vmul.f32 %v1217_v57, %v1192_v50  ;;  %v1689_v57 = vor.u32 %v1800_v56, %v1686_v27 }
 0x839   :  { %1444 = vmatpush.bf16.msrb.mxu0 %v1685_v55 }
 0x83a   :  { %v1220_v61 = vsel %vm1219_vm5, %v1192_v50, %v1218_v58  ;;  %v1818_v58 = vld [vmem:[#allocation26 + $0xa4] sm:$0xf]  ;;  %1470 = vmatpush.bf16.msra.mxu3 %v1689_v57 }
 0x83b   :  { %v1223_v62 = vsel %vm1221_vm12, %v1222_v59, %v1220_v61  ;;  %v1758_v59 = vld [vmem:[#allocation26 + $0xa8] sm:$0xf0] }
 0x83c   :  { %v1225_v63 = vmul.f32 %v1224_v60, %v1223_v62  ;;  %v1756_v60 = vld [vmem:[#allocation26 + $0xa0] sm:$0xf]  ;;  %v1761_v53 = vor.u32 %v1818_v58, %v1758_v59 }
 0x83d   :  { %v1757_v61 = vor.u32 %v1819_v5, %v1756_v60  ;;  %v1676_v62 = vld [vmem:[#allocation26] sm:$0xf] }
 0x83e   :  { %v1226_v0 = vadd.f32 %v1225_v63, %v1198_v51  ;;  %v1799_v63 = vld [vmem:[#allocation26 + $0x4] sm:$0xf0]  ;;  %1482 = vmatpush.bf16.msrb.mxu2 %v1761_v53 }
 0x83f   :  { %1456 = vmatpush.bf16.msra.mxu1 %v1757_v61 }
 0x840   :  { %v1228_v1 = vpack.c.bf16 %v1226_v0, %v1226_v0  ;;  %v1798_v0 = vld [vmem:[#allocation26 + $0x4] sm:$0xf] }
 0x841   :  { %v1681_v3 = vor.u32 %v1798_v0, %v1678_v2 }
 0x842   :  { %1672 = vmatmul.msk.bf16.vlgmr.msra.gmra.mxu0 %vm654_vm15, %v1228_v1  ;;  %1673 = vmatmul.msk.bf16.vlgmr.msrb.gmra.mxu3 %vm654_vm15, %v1228_v1  ;;  %v1677_v1 = vor.u32 %v1799_v63, %v1676_v62 }
 0x843   :  { %1471 = vmatpush.bf16.msra.mxu3 %v1681_v3  ;;  %1483 = vmatpush.bf16.msrb.mxu2 %v1753_v9 }
 0x844   :  { %1445 = vmatpush.bf16.msrb.mxu0 %v1677_v1  ;;  %1457 = vmatpush.bf16.msra.mxu1 %v1749_v11 }
 0x847   :  { %1484 = vmatpush.bf16.msrb.mxu2 %v1745_v15 }
 0x848   :  { %1458 = vmatpush.bf16.msra.mxu1 %v1741_v18 }
 0x881   :  { %v1205_v48 = vpop.permute.xlu2 %1204 }
 0x89b   :  { %v1201_v47 = vpop.permute.xlu1 %1200 }
 0x89c   :  { %v1208_v49 = vsel %vm366_vm0, %v1207_v46, %v1201_v47 }
 0x89d   :  { %v1209_v50 = vsel %vm657_vm1, %v1208_v49, %v1205_v48 }
 0x89e   :  { %v1210_v51 = vsel %vm659_vm6, %v1209_v50, 0.0 }
 0x89f   :  { %1211 = vst [vmem:[%s2510_s3] sm:$0x3] %v1210_v51  ;;  %s1671_s3 = sld [smem:[#allocation2 + $0x4]] }
 0x8a5   :  { %v1278_v23 = vstv %s1671_s3 }
 0x8bf   :  { %v1259_v21 = vpop.f32.mrf.mxu0 }
 0x8c0   :  { %v1260_v24 = vadd.f32 %v1259_v21, %v1232_v20 }
 0x8c2   :  { %vm1276_vm0 = vcmp.ge.f32.partialorder %v1260_v24, 0.0  ;;  %v1279_v25 = vmul.f32 %v1278_v23, %v1260_v24 }
 0x8c4   :  { %v1281_v28 = vsel %vm1276_vm0, %v1260_v24, %v1279_v25 }
 0x8c5   :  { %v1283_v29 = vpack.c.bf16 %v1281_v28, %v1281_v28  ;;  %v1272_v30 = vpop.f32.mrf.mxu3 }
 0x8c6   :  { %v1273_v31 = vadd.f32 %v1272_v30, %v1233_v26 }
 0x8c7   :  { %v1261_v32 = vpop.f32.mrf.mxu0  ;;  %1446 = vmatmul.bf16.vlgmr.msrb.gmra.mxu0 %v1283_v29  ;;  %1472 = vmatmul.bf16.vlgmr.msra.gmra.mxu3 %v1283_v29 }
 0x8c8   :  { %vm1277_vm15 = vcmp.ge.f32.partialorder %v1273_v31, 0.0  ;;  %v1280_v33 = vmul.f32 %v1278_v23, %v1273_v31 }
 0x8ca   :  { %v1282_v34 = vsel %vm1277_vm15, %v1273_v31, %v1280_v33 }
 0x8cb   :  { %v1284_v35 = vpack.c.bf16 %v1282_v34, %v1282_v34 }
 0x8cd   :  { %v1274_v36 = vpop.f32.mrf.mxu3  ;;  %1770 = vmatmul.msk.bf16.vlgmr.msra.gmra.mxu1 %vm442_vm4, %v1284_v35  ;;  %1771 = vmatmul.msk.bf16.vlgmr.msrb.gmra.mxu2 %vm442_vm4, %v1284_v35 }
 0x944   :  { %v1447_v37 = vpop.f32.mrf.mxu0 }
 0x945   :  { %v1448_v42 = vadd.f32 %v1447_v37, %v1311_v22 }
 0x94a   :  { %v1460_v39 = vpop.f32.mrf.mxu1  ;;  %v1473_v6 = vpop.f32.mrf.mxu3 }
 0x94b   :  { %v1474_v43 = vadd.f32 %v1473_v6, %v1312_v40  ;;  %v1461_v45 = vadd.f32 %v1460_v39, %v1448_v42 }
 0x94c   :  { %v1449_v41 = vpop.f32.mrf.mxu0 }
 0x950   :  { %v1486_v44 = vpop.f32.mrf.mxu2 }
 0x951   :  { %v1487_v16 = vadd.f32 %v1486_v44, %v1474_v43 }
 0x952   :  { %v1462_v46 = vpop.f32.mrf.mxu1  ;;  %v1475_v47 = vpop.f32.mrf.mxu3 }
 0x953   :  { %1910 = vtanh.f32 %v1487_v16 }
 0x954   :  { %1912 = vtanh.f32 %v1461_v45 }
 0x958   :  { %v1488_v48 = vpop.f32.mrf.mxu2 }
 0x959   :  { %v1911_v49 = vpop.eup %1910 }
 0x95a   :  { %v1494_v50 = vrot.slane %v1911_v49, 6  ;;  %v1913_v51 = vpop.eup %1912 }
 0x95c   :  { %v1495_v52 = vsel %vm792_vm9, %v1913_v51, %v1494_v50 }
 0x95d   :  { %1497 = vst [vmem:[%s2515_s8] sm:$0xf] %v1495_v52 }
 0x95e   :  { %1510 = vsyncpa [#allocation3], 1 }
 0x95f   :  { %1511 = vsyncpa [#allocation7], 1 }
 0x960   :  { %1512 = vsyncpa [#allocation10], 1 }
 0x961   :  { %1513 = vsyncpa [#allocation13], 1 }
 0x962   :  { %1514 = vsyncpa [#allocation16], 1 }
 0x963   :  { %1515 = vsyncpa [#allocation19], 1 }
 0x964   :  { %1516 = vsyncpa [#allocation22], 1 }
 0x965   :  { %1517 = vsyncpa [#allocation25], 1 }
 0x966   :  { %1518 = vsyncpa [#allocation4], 1 }

</bundles_post_ra>
